<compile_context>
chip_gen: v7x
topology: tpu7x:2x2x1
jax: 0.10.0
libtpu: 0.0.40
codegen_flags: <defaults>
</compile_context>

<pallas_src>
import jax
import jax.numpy as jnp
from jax.experimental import pallas as pl
from jax.experimental.pallas import tpu as pltpu   # noqa: F401 (TPU backend)

# ----------------------------------------------------------------------------
# Small (TPU-friendly) hyper-parameters consistent with the module's structure.
# ----------------------------------------------------------------------------
CHAR_VOCAB = 55     # char_vocab_size
E          = 8      # input_dim_1 (char embedding dim)
L          = 16     # input_dim_2 (chars per word)
KW         = 5      # kernel_width
H          = 64     # hidden_dim (CNN / highway width)
LH         = 32     # lstm_hidden
V_OUT      = 128    # output_dim
B          = 2      # batch
T          = 8      # sequence length (words)
P          = L - KW + 1          # conv positions / maxpool kernel = 12
KWE        = KW * E              # conv kernel size over flat chars = 40


# ----------------------------------------------------------------------------
# Fused forward kernel: char-CNN + highway + 2 direction-fused LSTM layers
# + readout, all in VMEM, no grid.
# ----------------------------------------------------------------------------
def fused_lm_kernel(x_ref,                       # (T*B, L*E)
                    wcf_ref, bc_ref,             # (L*E, P*H), (1, H)
                    wt_ref, bt_ref,              # (H, H), (1, H)
                    wh_ref, bh_ref,              # (H, H), (1, H)
                    wih1_ref, whh1_ref, b1_ref,  # (H, 8*LH), (2*LH, 8*LH), (1, 8*LH)
                    wih2_ref, whh2_ref, b2_ref,  # (2*LH, 8*LH), (2*LH, 8*LH), (1, 8*LH)
                    wr_ref, br_ref,              # (2*LH, V_OUT), (1, V_OUT)
                    out_ref):                    # ((T-2)*B, V_OUT)
    f32 = jnp.float32
    x = x_ref[...]                                               # (T*B, 128)

    # --- char-CNN: single matmul against the im2col-folded conv weight ------
    conv_all = jnp.dot(x, wcf_ref[...], preferred_element_type=f32)  # (T*B, P*H)
    pooled = conv_all[:, 0:H]
    for s in range(1, P):                                        # max-pool over P
        pooled = jnp.maximum(pooled, conv_all[:, s * H:(s + 1) * H])
    # tanh is monotone: max_s tanh(conv_s + b) == tanh(max_s conv_s + b)
    pooled = jnp.tanh(pooled + bc_ref[...])                      # (T*B, H)

    # --- highway -------------------------------------------------------------
    tgate = jax.nn.sigmoid(
        jnp.dot(pooled, wt_ref[...], preferred_element_type=f32) + bt_ref[...])
    hval = jax.nn.relu(
        jnp.dot(pooled, wh_ref[...], preferred_element_type=f32) + bh_ref[...])
    hw = tgate * hval + (1.0 - tgate) * pooled                   # (T*B, H), row = t*B + b

    # --- two stacked direction-fused LSTM layers, time loop fully unrolled ---
    wih1, whh1, b1 = wih1_ref[...], whh1_ref[...], b1_ref[...]
    wih2, whh2, b2 = wih2_ref[...], whh2_ref[...], b2_ref[...]
    G = 2 * LH                                                   # per-gate width (fwd|bwd)

    def cell(x_t, h, c, wih, whh, b):
        # single 256-lane-wide gate matmul covering both directions
        gates = (jnp.dot(x_t, wih, preferred_element_type=f32)
                 + jnp.dot(h, whh, preferred_element_type=f32) + b)   # (B, 8*LH)
        i = jax.nn.sigmoid(gates[:, 0 * G:1 * G])
        f = jax.nn.sigmoid(gates[:, 1 * G:2 * G])
        g = jnp.tanh(      gates[:, 2 * G:3 * G])
        o = jax.nn.sigmoid(gates[:, 3 * G:4 * G])
        c_new = f * c + i * g
        h_new = o * jnp.tanh(c_new)
        return h_new, c_new

    zero = jnp.zeros((B, G), f32)                                # [h_fwd | h_bwd]
    h1, c1, h2, c2 = zero, zero, zero, zero
    h2_seq = []
    for t in range(T):                                           # T = 8, unrolled
        x_t = hw[t * B:(t + 1) * B, :]                           # (B, H)
        h1, c1 = cell(x_t, h1, c1, wih1, whh1, b1)               # layer-1 fwd+bwd
        h2, c2 = cell(h1, h2, c2, wih2, whh2, b2)                # layer-2 fwd+bwd
        h2_seq.append(h2)                                        # (B, 2*LH)

    # --- readout features: concat(forward[t], backward[t+2]) ----------------
    # TODO(synk): nn.Dropout(p=0.5) is identity in eval mode; training-mode
    # RNG masking is not reproduced here.
    feat = jnp.concatenate(
        [jnp.concatenate([h2_seq[t][:, :LH], h2_seq[t + 2][:, LH:]], axis=1)
         for t in range(T - 2)], axis=0)                         # ((T-2)*B, 2*LH)

    out_ref[...] = (jnp.dot(feat, wr_ref[...], preferred_element_type=f32)
                    + br_ref[...])                               # ((T-2)*B, V_OUT)


# ----------------------------------------------------------------------------
# Parameter construction helpers (direction fusion + im2col-folded conv weight)
# ----------------------------------------------------------------------------
def _interleave_gate_cols(w_f, w_b):
    """(D, 4*LH) per direction -> (D, 8*LH) with gate-major / direction-minor cols."""
    cols = []
    for gi in range(4):                                  # PyTorch gate order i, f, g, o
        cols.append(w_f[:, gi * LH:(gi + 1) * LH])
        cols.append(w_b[:, gi * LH:(gi + 1) * LH])
    return jnp.concatenate(cols, axis=1)


def _blockdiag_dirs(w_f, w_b):
    """(LH, 4*LH) per direction -> (2*LH, 8*LH); fwd rows feed only fwd columns."""
    z = jnp.zeros_like(w_f)
    top = _interleave_gate_cols(w_f, z)
    bot = _interleave_gate_cols(z, w_b)
    return jnp.concatenate([top, bot], axis=0)


def init_params(key):
    ks = jax.random.split(key, 24)
    u = lambda k, shape: jax.random.uniform(k, shape, jnp.float32, -0.05, 0.05)

    p = {
        "embedding":   u(ks[0], (CHAR_VOCAB, E)),
        "conv_b":      u(ks[2], (1, H)),
        "transform_w": u(ks[3], (H, H)),
        "transform_b": u(ks[4], (1, H)),
        "highway_w":   u(ks[5], (H, H)),
        "highway_b":   u(ks[6], (1, H)),
        "readout_w":   u(ks[7], (2 * LH, V_OUT)),
        "readout_b":   jnp.zeros((1, V_OUT), jnp.float32),
    }

    # Conv1d weight (H, 1, KW*E) transposed -> (KWE, H), then fold the im2col
    # pattern into the weight so the kernel does ONE (T*B, L*E) x (L*E, P*H) dot.
    conv_w = u(ks[1], (KWE, H))
    wcf = jnp.zeros((L * E, P * H), jnp.float32)
    for s in range(P):
        wcf = wcf.at[s * E: s * E + KWE, s * H:(s + 1) * H].set(conv_w)
    p["conv_wf"] = wcf

    def lstm_dir(k0, k1, k2, k3, d_in):
        wih = u(k0, (d_in, 4 * LH))                      # (W_ih)^T, gate order i,f,g,o
        whh = u(k1, (LH, 4 * LH))                        # (W_hh)^T
        b = u(k2, (1, 4 * LH)) + u(k3, (1, 4 * LH))      # b_ih + b_hh
        return wih, whh, b

    f1 = lstm_dir(*ks[8:12],  H)
    b1 = lstm_dir(*ks[12:16], H)
    f2 = lstm_dir(*ks[16:20], LH)
    b2 = lstm_dir(*ks[20:24], LH)

    # Layer 1: both directions read the same highway input -> dense combined W_ih.
    p["lstm1_wih"] = _interleave_gate_cols(f1[0], b1[0])          # (H, 8*LH)
    p["lstm1_whh"] = _blockdiag_dirs(f1[1], b1[1])                # (2*LH, 8*LH)
    p["lstm1_b"]   = _interleave_gate_cols(f1[2], b1[2])          # (1, 8*LH)
    # Layer 2: fwd LSTM reads layer-1 fwd output, bwd reads bwd -> block diagonal.
    p["lstm2_wih"] = _blockdiag_dirs(f2[0], b2[0])                # (2*LH, 8*LH)
    p["lstm2_whh"] = _blockdiag_dirs(f2[1], b2[1])                # (2*LH, 8*LH)
    p["lstm2_b"]   = _interleave_gate_cols(f2[2], b2[2])          # (1, 8*LH)
    return p


# ----------------------------------------------------------------------------
# Forward wrapper: embedding gather (glue) + one fused pallas_call.
# ----------------------------------------------------------------------------
def language_model_forward(x_tokens, p):
    emb = p["embedding"][x_tokens]                   # (B, T, L, E)   gather (glue)
    emb = jnp.transpose(emb, (1, 0, 2, 3))           # (T, B, L, E)   seq-major
    x_flat = emb.reshape(T * B, L * E)               # one lane-dense 128-wide row/word

    out = pl.pallas_call(
        fused_lm_kernel,
        out_shape=jax.ShapeDtypeStruct(((T - 2) * B, V_OUT), jnp.float32),
    )(x_flat,
      p["conv_wf"], p["conv_b"],
      p["transform_w"], p["transform_b"],
      p["highway_w"], p["highway_b"],
      p["lstm1_wih"], p["lstm1_whh"], p["lstm1_b"],
      p["lstm2_wih"], p["lstm2_whh"], p["lstm2_b"],
      p["readout_w"], p["readout_b"])

    # kernel rows are (t-major, b-minor)  ->  (B, T-2, V_OUT)
    return jnp.transpose(out.reshape(T - 2, B, V_OUT), (1, 0, 2))


if __name__ == "__main__":
    key = jax.random.PRNGKey(0)
    k_tok, k_par = jax.random.split(key)
    x = jax.random.randint(k_tok, (B, T, L), 0, CHAR_VOCAB, dtype=jnp.int32)
    params = init_params(k_par)

    fwd = jax.jit(language_model_forward)
    result = fwd(x, params)
    jax.block_until_ready(result)
    assert result.shape == (B, T - 2, V_OUT)
    assert result.dtype == jnp.float32
    print("KERNEL_OK")
</pallas_src>

<mosaic_0001>
module attributes {stable_mosaic.version = 11 : i64} {
  func.func @fused_lm_kernel(%arg0: memref<16x128xf32, #tpu.memory_space<vmem>>, %arg1: memref<128x768xf32, #tpu.memory_space<vmem>>, %arg2: memref<1x64xf32, #tpu.memory_space<vmem>>, %arg3: memref<64x64xf32, #tpu.memory_space<vmem>>, %arg4: memref<1x64xf32, #tpu.memory_space<vmem>>, %arg5: memref<64x64xf32, #tpu.memory_space<vmem>>, %arg6: memref<1x64xf32, #tpu.memory_space<vmem>>, %arg7: memref<64x256xf32, #tpu.memory_space<vmem>>, %arg8: memref<64x256xf32, #tpu.memory_space<vmem>>, %arg9: memref<1x256xf32, #tpu.memory_space<vmem>>, %arg10: memref<64x256xf32, #tpu.memory_space<vmem>>, %arg11: memref<64x256xf32, #tpu.memory_space<vmem>>, %arg12: memref<1x256xf32, #tpu.memory_space<vmem>>, %arg13: memref<64x128xf32, #tpu.memory_space<vmem>>, %arg14: memref<1x128xf32, #tpu.memory_space<vmem>>, %arg15: memref<12x128xf32, #tpu.memory_space<vmem>>) attributes {dimension_semantics = [], scalar_prefetch = 0 : i64, scratch_operands = 0 : i64, tpu.core_type = #tpu.core_type<tc>} {
    %c0 = arith.constant 0 : index
    %c0_0 = arith.constant 0 : index
    %0 = vector.load %arg0[%c0, %c0_0] : memref<16x128xf32, #tpu.memory_space<vmem>>, vector<16x128xf32>
    %c0_1 = arith.constant 0 : index
    %c0_2 = arith.constant 0 : index
    %1 = vector.load %arg1[%c0_1, %c0_2] : memref<128x768xf32, #tpu.memory_space<vmem>>, vector<128x768xf32>
    %cst = arith.constant dense<0.000000e+00> : vector<16x768xf32>
    %2 = tpu.matmul %0, %1, %cst {dimension_numbers = #tpu.dot_dimension_numbers<[1], [0], [0], [1], [0, 0, 1, 1], [], []>} : vector<16x128xf32>, vector<128x768xf32>, vector<16x768xf32> -> vector<16x768xf32>
    %3 = vector.extract_strided_slice %2 {offsets = [0, 0], sizes = [16, 64], strides = [1, 1]} : vector<16x768xf32> to vector<16x64xf32>
    %4 = vector.extract_strided_slice %2 {offsets = [0, 64], sizes = [16, 64], strides = [1, 1]} : vector<16x768xf32> to vector<16x64xf32>
    %5 = arith.maximumf %3, %4 : vector<16x64xf32>
    %6 = vector.extract_strided_slice %2 {offsets = [0, 128], sizes = [16, 64], strides = [1, 1]} : vector<16x768xf32> to vector<16x64xf32>
    %7 = arith.maximumf %5, %6 : vector<16x64xf32>
    %8 = vector.extract_strided_slice %2 {offsets = [0, 192], sizes = [16, 64], strides = [1, 1]} : vector<16x768xf32> to vector<16x64xf32>
    %9 = arith.maximumf %7, %8 : vector<16x64xf32>
    %10 = vector.extract_strided_slice %2 {offsets = [0, 256], sizes = [16, 64], strides = [1, 1]} : vector<16x768xf32> to vector<16x64xf32>
    %11 = arith.maximumf %9, %10 : vector<16x64xf32>
    %12 = vector.extract_strided_slice %2 {offsets = [0, 320], sizes = [16, 64], strides = [1, 1]} : vector<16x768xf32> to vector<16x64xf32>
    %13 = arith.maximumf %11, %12 : vector<16x64xf32>
    %14 = vector.extract_strided_slice %2 {offsets = [0, 384], sizes = [16, 64], strides = [1, 1]} : vector<16x768xf32> to vector<16x64xf32>
    %15 = arith.maximumf %13, %14 : vector<16x64xf32>
    %16 = vector.extract_strided_slice %2 {offsets = [0, 448], sizes = [16, 64], strides = [1, 1]} : vector<16x768xf32> to vector<16x64xf32>
    %17 = arith.maximumf %15, %16 : vector<16x64xf32>
    %18 = vector.extract_strided_slice %2 {offsets = [0, 512], sizes = [16, 64], strides = [1, 1]} : vector<16x768xf32> to vector<16x64xf32>
    %19 = arith.maximumf %17, %18 : vector<16x64xf32>
    %20 = vector.extract_strided_slice %2 {offsets = [0, 576], sizes = [16, 64], strides = [1, 1]} : vector<16x768xf32> to vector<16x64xf32>
    %21 = arith.maximumf %19, %20 : vector<16x64xf32>
    %22 = vector.extract_strided_slice %2 {offsets = [0, 640], sizes = [16, 64], strides = [1, 1]} : vector<16x768xf32> to vector<16x64xf32>
    %23 = arith.maximumf %21, %22 : vector<16x64xf32>
    %24 = vector.extract_strided_slice %2 {offsets = [0, 704], sizes = [16, 64], strides = [1, 1]} : vector<16x768xf32> to vector<16x64xf32>
    %25 = arith.maximumf %23, %24 : vector<16x64xf32>
    %c0_3 = arith.constant 0 : index
    %c0_4 = arith.constant 0 : index
    %26 = vector.load %arg2[%c0_3, %c0_4] : memref<1x64xf32, #tpu.memory_space<vmem>>, vector<1x64xf32>
    %27 = vector.broadcast %26 : vector<1x64xf32> to vector<16x64xf32>
    %28 = arith.addf %25, %27 : vector<16x64xf32>
    %29 = math.tanh %28 : vector<16x64xf32>
    %c0_5 = arith.constant 0 : index
    %c0_6 = arith.constant 0 : index
    %30 = vector.load %arg3[%c0_5, %c0_6] : memref<64x64xf32, #tpu.memory_space<vmem>>, vector<64x64xf32>
    %cst_7 = arith.constant dense<0.000000e+00> : vector<16x64xf32>
    %31 = tpu.matmul %29, %30, %cst_7 {dimension_numbers = #tpu.dot_dimension_numbers<[1], [0], [0], [1], [0, 0, 1, 1], [], []>} : vector<16x64xf32>, vector<64x64xf32>, vector<16x64xf32> -> vector<16x64xf32>
    %c0_8 = arith.constant 0 : index
    %c0_9 = arith.constant 0 : index
    %32 = vector.load %arg4[%c0_8, %c0_9] : memref<1x64xf32, #tpu.memory_space<vmem>>, vector<1x64xf32>
    %33 = vector.broadcast %32 : vector<1x64xf32> to vector<16x64xf32>
    %34 = arith.addf %31, %33 : vector<16x64xf32>
    %35 = arith.negf %34 : vector<16x64xf32>
    %36 = math.exp %35 : vector<16x64xf32>
    %cst_10 = arith.constant 1.000000e+00 : f32
    %37 = vector.broadcast %cst_10 : f32 to vector<16x64xf32>
    %38 = arith.addf %37, %36 : vector<16x64xf32>
    %39 = arith.divf %37, %38 : vector<16x64xf32>
    %c0_11 = arith.constant 0 : index
    %c0_12 = arith.constant 0 : index
    %40 = vector.load %arg5[%c0_11, %c0_12] : memref<64x64xf32, #tpu.memory_space<vmem>>, vector<64x64xf32>
    %cst_13 = arith.constant dense<0.000000e+00> : vector<16x64xf32>
    %41 = tpu.matmul %29, %40, %cst_13 {dimension_numbers = #tpu.dot_dimension_numbers<[1], [0], [0], [1], [0, 0, 1, 1], [], []>} : vector<16x64xf32>, vector<64x64xf32>, vector<16x64xf32> -> vector<16x64xf32>
    %c0_14 = arith.constant 0 : index
    %c0_15 = arith.constant 0 : index
    %42 = vector.load %arg6[%c0_14, %c0_15] : memref<1x64xf32, #tpu.memory_space<vmem>>, vector<1x64xf32>
    %43 = vector.broadcast %42 : vector<1x64xf32> to vector<16x64xf32>
    %44 = arith.addf %41, %43 : vector<16x64xf32>
    %cst_16 = arith.constant 0.000000e+00 : f32
    %45 = vector.broadcast %cst_16 : f32 to vector<16x64xf32>
    %46 = arith.maximumf %44, %45 : vector<16x64xf32>
    %47 = arith.mulf %39, %46 : vector<16x64xf32>
    %cst_17 = arith.constant 1.000000e+00 : f32
    %48 = vector.broadcast %cst_17 : f32 to vector<16x64xf32>
    %49 = arith.subf %48, %39 : vector<16x64xf32>
    %50 = arith.mulf %49, %29 : vector<16x64xf32>
    %51 = arith.addf %47, %50 : vector<16x64xf32>
    %c0_18 = arith.constant 0 : index
    %c0_19 = arith.constant 0 : index
    %52 = vector.load %arg7[%c0_18, %c0_19] : memref<64x256xf32, #tpu.memory_space<vmem>>, vector<64x256xf32>
    %c0_20 = arith.constant 0 : index
    %c0_21 = arith.constant 0 : index
    %53 = vector.load %arg8[%c0_20, %c0_21] : memref<64x256xf32, #tpu.memory_space<vmem>>, vector<64x256xf32>
    %c0_22 = arith.constant 0 : index
    %c0_23 = arith.constant 0 : index
    %54 = vector.load %arg9[%c0_22, %c0_23] : memref<1x256xf32, #tpu.memory_space<vmem>>, vector<1x256xf32>
    %c0_24 = arith.constant 0 : index
    %c0_25 = arith.constant 0 : index
    %55 = vector.load %arg10[%c0_24, %c0_25] : memref<64x256xf32, #tpu.memory_space<vmem>>, vector<64x256xf32>
    %c0_26 = arith.constant 0 : index
    %c0_27 = arith.constant 0 : index
    %56 = vector.load %arg11[%c0_26, %c0_27] : memref<64x256xf32, #tpu.memory_space<vmem>>, vector<64x256xf32>
    %c0_28 = arith.constant 0 : index
    %c0_29 = arith.constant 0 : index
    %57 = vector.load %arg12[%c0_28, %c0_29] : memref<1x256xf32, #tpu.memory_space<vmem>>, vector<1x256xf32>
    %cst_30 = arith.constant 0.000000e+00 : f32
    %58 = vector.broadcast %cst_30 : f32 to vector<2x64xf32>
    %59 = vector.extract_strided_slice %51 {offsets = [0, 0], sizes = [2, 64], strides = [1, 1]} : vector<16x64xf32> to vector<2x64xf32>
    %cst_31 = arith.constant dense<0.000000e+00> : vector<2x256xf32>
    %60 = tpu.matmul %59, %52, %cst_31 {dimension_numbers = #tpu.dot_dimension_numbers<[1], [0], [0], [1], [0, 0, 1, 1], [], []>} : vector<2x64xf32>, vector<64x256xf32>, vector<2x256xf32> -> vector<2x256xf32>
    %cst_32 = arith.constant dense<0.000000e+00> : vector<2x256xf32>
    %61 = tpu.matmul %58, %53, %cst_32 {dimension_numbers = #tpu.dot_dimension_numbers<[1], [0], [0], [1], [0, 0, 1, 1], [], []>} : vector<2x64xf32>, vector<64x256xf32>, vector<2x256xf32> -> vector<2x256xf32>
    %62 = arith.addf %60, %61 : vector<2x256xf32>
    %63 = vector.broadcast %54 : vector<1x256xf32> to vector<2x256xf32>
    %64 = arith.addf %62, %63 : vector<2x256xf32>
    %65 = vector.extract_strided_slice %64 {offsets = [0, 0], sizes = [2, 64], strides = [1, 1]} : vector<2x256xf32> to vector<2x64xf32>
    %66 = arith.negf %65 : vector<2x64xf32>
    %67 = math.exp %66 : vector<2x64xf32>
    %cst_33 = arith.constant 1.000000e+00 : f32
    %68 = vector.broadcast %cst_33 : f32 to vector<2x64xf32>
    %69 = arith.addf %68, %67 : vector<2x64xf32>
    %70 = arith.divf %68, %69 : vector<2x64xf32>
    %71 = vector.extract_strided_slice %64 {offsets = [0, 64], sizes = [2, 64], strides = [1, 1]} : vector<2x256xf32> to vector<2x64xf32>
    %72 = arith.negf %71 : vector<2x64xf32>
    %73 = math.exp %72 : vector<2x64xf32>
    %cst_34 = arith.constant 1.000000e+00 : f32
    %74 = vector.broadcast %cst_34 : f32 to vector<2x64xf32>
    %75 = arith.addf %74, %73 : vector<2x64xf32>
    %76 = arith.divf %74, %75 : vector<2x64xf32>
    %77 = vector.extract_strided_slice %64 {offsets = [0, 128], sizes = [2, 64], strides = [1, 1]} : vector<2x256xf32> to vector<2x64xf32>
    %78 = math.tanh %77 : vector<2x64xf32>
    %79 = vector.extract_strided_slice %64 {offsets = [0, 192], sizes = [2, 64], strides = [1, 1]} : vector<2x256xf32> to vector<2x64xf32>
    %80 = arith.negf %79 : vector<2x64xf32>
    %81 = math.exp %80 : vector<2x64xf32>
    %cst_35 = arith.constant 1.000000e+00 : f32
    %82 = vector.broadcast %cst_35 : f32 to vector<2x64xf32>
    %83 = arith.addf %82, %81 : vector<2x64xf32>
    %84 = arith.divf %82, %83 : vector<2x64xf32>
    %85 = arith.mulf %76, %58 : vector<2x64xf32>
    %86 = arith.mulf %70, %78 : vector<2x64xf32>
    %87 = arith.addf %85, %86 : vector<2x64xf32>
    %88 = math.tanh %87 : vector<2x64xf32>
    %89 = arith.mulf %84, %88 : vector<2x64xf32>
    %cst_36 = arith.constant dense<0.000000e+00> : vector<2x256xf32>
    %90 = tpu.matmul %89, %55, %cst_36 {dimension_numbers = #tpu.dot_dimension_numbers<[1], [0], [0], [1], [0, 0, 1, 1], [], []>} : vector<2x64xf32>, vector<64x256xf32>, vector<2x256xf32> -> vector<2x256xf32>
    %cst_37 = arith.constant dense<0.000000e+00> : vector<2x256xf32>
    %91 = tpu.matmul %58, %56, %cst_37 {dimension_numbers = #tpu.dot_dimension_numbers<[1], [0], [0], [1], [0, 0, 1, 1], [], []>} : vector<2x64xf32>, vector<64x256xf32>, vector<2x256xf32> -> vector<2x256xf32>
    %92 = arith.addf %90, %91 : vector<2x256xf32>
    %93 = vector.broadcast %57 : vector<1x256xf32> to vector<2x256xf32>
    %94 = arith.addf %92, %93 : vector<2x256xf32>
    %95 = vector.extract_strided_slice %94 {offsets = [0, 0], sizes = [2, 64], strides = [1, 1]} : vector<2x256xf32> to vector<2x64xf32>
    %96 = arith.negf %95 : vector<2x64xf32>
    %97 = math.exp %96 : vector<2x64xf32>
    %cst_38 = arith.constant 1.000000e+00 : f32
    %98 = vector.broadcast %cst_38 : f32 to vector<2x64xf32>
    %99 = arith.addf %98, %97 : vector<2x64xf32>
    %100 = arith.divf %98, %99 : vector<2x64xf32>
    %101 = vector.extract_strided_slice %94 {offsets = [0, 64], sizes = [2, 64], strides = [1, 1]} : vector<2x256xf32> to vector<2x64xf32>
    %102 = arith.negf %101 : vector<2x64xf32>
    %103 = math.exp %102 : vector<2x64xf32>
    %cst_39 = arith.constant 1.000000e+00 : f32
    %104 = vector.broadcast %cst_39 : f32 to vector<2x64xf32>
    %105 = arith.addf %104, %103 : vector<2x64xf32>
    %106 = arith.divf %104, %105 : vector<2x64xf32>
    %107 = vector.extract_strided_slice %94 {offsets = [0, 128], sizes = [2, 64], strides = [1, 1]} : vector<2x256xf32> to vector<2x64xf32>
    %108 = math.tanh %107 : vector<2x64xf32>
    %109 = vector.extract_strided_slice %94 {offsets = [0, 192], sizes = [2, 64], strides = [1, 1]} : vector<2x256xf32> to vector<2x64xf32>
    %110 = arith.negf %109 : vector<2x64xf32>
    %111 = math.exp %110 : vector<2x64xf32>
    %cst_40 = arith.constant 1.000000e+00 : f32
    %112 = vector.broadcast %cst_40 : f32 to vector<2x64xf32>
    %113 = arith.addf %112, %111 : vector<2x64xf32>
    %114 = arith.divf %112, %113 : vector<2x64xf32>
    %115 = arith.mulf %106, %58 : vector<2x64xf32>
    %116 = arith.mulf %100, %108 : vector<2x64xf32>
    %117 = arith.addf %115, %116 : vector<2x64xf32>
    %118 = math.tanh %117 : vector<2x64xf32>
    %119 = arith.mulf %114, %118 : vector<2x64xf32>
    %120 = vector.extract_strided_slice %51 {offsets = [2, 0], sizes = [2, 64], strides = [1, 1]} : vector<16x64xf32> to vector<2x64xf32>
    %cst_41 = arith.constant dense<0.000000e+00> : vector<2x256xf32>
    %121 = tpu.matmul %120, %52, %cst_41 {dimension_numbers = #tpu.dot_dimension_numbers<[1], [0], [0], [1], [0, 0, 1, 1], [], []>} : vector<2x64xf32>, vector<64x256xf32>, vector<2x256xf32> -> vector<2x256xf32>
    %cst_42 = arith.constant dense<0.000000e+00> : vector<2x256xf32>
    %122 = tpu.matmul %89, %53, %cst_42 {dimension_numbers = #tpu.dot_dimension_numbers<[1], [0], [0], [1], [0, 0, 1, 1], [], []>} : vector<2x64xf32>, vector<64x256xf32>, vector<2x256xf32> -> vector<2x256xf32>
    %123 = arith.addf %121, %122 : vector<2x256xf32>
    %124 = vector.broadcast %54 : vector<1x256xf32> to vector<2x256xf32>
    %125 = arith.addf %123, %124 : vector<2x256xf32>
    %126 = vector.extract_strided_slice %125 {offsets = [0, 0], sizes = [2, 64], strides = [1, 1]} : vector<2x256xf32> to vector<2x64xf32>
    %127 = arith.negf %126 : vector<2x64xf32>
    %128 = math.exp %127 : vector<2x64xf32>
    %cst_43 = arith.constant 1.000000e+00 : f32
    %129 = vector.broadcast %cst_43 : f32 to vector<2x64xf32>
    %130 = arith.addf %129, %128 : vector<2x64xf32>
    %131 = arith.divf %129, %130 : vector<2x64xf32>
    %132 = vector.extract_strided_slice %125 {offsets = [0, 64], sizes = [2, 64], strides = [1, 1]} : vector<2x256xf32> to vector<2x64xf32>
    %133 = arith.negf %132 : vector<2x64xf32>
    %134 = math.exp %133 : vector<2x64xf32>
    %cst_44 = arith.constant 1.000000e+00 : f32
    %135 = vector.broadcast %cst_44 : f32 to vector<2x64xf32>
    %136 = arith.addf %135, %134 : vector<2x64xf32>
    %137 = arith.divf %135, %136 : vector<2x64xf32>
    %138 = vector.extract_strided_slice %125 {offsets = [0, 128], sizes = [2, 64], strides = [1, 1]} : vector<2x256xf32> to vector<2x64xf32>
    %139 = math.tanh %138 : vector<2x64xf32>
    %140 = vector.extract_strided_slice %125 {offsets = [0, 192], sizes = [2, 64], strides = [1, 1]} : vector<2x256xf32> to vector<2x64xf32>
    %141 = arith.negf %140 : vector<2x64xf32>
    %142 = math.exp %141 : vector<2x64xf32>
    %cst_45 = arith.constant 1.000000e+00 : f32
    %143 = vector.broadcast %cst_45 : f32 to vector<2x64xf32>
    %144 = arith.addf %143, %142 : vector<2x64xf32>
    %145 = arith.divf %143, %144 : vector<2x64xf32>
    %146 = arith.mulf %137, %87 : vector<2x64xf32>
    %147 = arith.mulf %131, %139 : vector<2x64xf32>
    %148 = arith.addf %146, %147 : vector<2x64xf32>
    %149 = math.tanh %148 : vector<2x64xf32>
    %150 = arith.mulf %145, %149 : vector<2x64xf32>
    %cst_46 = arith.constant dense<0.000000e+00> : vector<2x256xf32>
    %151 = tpu.matmul %150, %55, %cst_46 {dimension_numbers = #tpu.dot_dimension_numbers<[1], [0], [0], [1], [0, 0, 1, 1], [], []>} : vector<2x64xf32>, vector<64x256xf32>, vector<2x256xf32> -> vector<2x256xf32>
    %cst_47 = arith.constant dense<0.000000e+00> : vector<2x256xf32>
    %152 = tpu.matmul %119, %56, %cst_47 {dimension_numbers = #tpu.dot_dimension_numbers<[1], [0], [0], [1], [0, 0, 1, 1], [], []>} : vector<2x64xf32>, vector<64x256xf32>, vector<2x256xf32> -> vector<2x256xf32>
    %153 = arith.addf %151, %152 : vector<2x256xf32>
    %154 = vector.broadcast %57 : vector<1x256xf32> to vector<2x256xf32>
    %155 = arith.addf %153, %154 : vector<2x256xf32>
    %156 = vector.extract_strided_slice %155 {offsets = [0, 0], sizes = [2, 64], strides = [1, 1]} : vector<2x256xf32> to vector<2x64xf32>
    %157 = arith.negf %156 : vector<2x64xf32>
    %158 = math.exp %157 : vector<2x64xf32>
    %cst_48 = arith.constant 1.000000e+00 : f32
    %159 = vector.broadcast %cst_48 : f32 to vector<2x64xf32>
    %160 = arith.addf %159, %158 : vector<2x64xf32>
    %161 = arith.divf %159, %160 : vector<2x64xf32>
    %162 = vector.extract_strided_slice %155 {offsets = [0, 64], sizes = [2, 64], strides = [1, 1]} : vector<2x256xf32> to vector<2x64xf32>
    %163 = arith.negf %162 : vector<2x64xf32>
    %164 = math.exp %163 : vector<2x64xf32>
    %cst_49 = arith.constant 1.000000e+00 : f32
    %165 = vector.broadcast %cst_49 : f32 to vector<2x64xf32>
    %166 = arith.addf %165, %164 : vector<2x64xf32>
    %167 = arith.divf %165, %166 : vector<2x64xf32>
    %168 = vector.extract_strided_slice %155 {offsets = [0, 128], sizes = [2, 64], strides = [1, 1]} : vector<2x256xf32> to vector<2x64xf32>
    %169 = math.tanh %168 : vector<2x64xf32>
    %170 = vector.extract_strided_slice %155 {offsets = [0, 192], sizes = [2, 64], strides = [1, 1]} : vector<2x256xf32> to vector<2x64xf32>
    %171 = arith.negf %170 : vector<2x64xf32>
    %172 = math.exp %171 : vector<2x64xf32>
    %cst_50 = arith.constant 1.000000e+00 : f32
    %173 = vector.broadcast %cst_50 : f32 to vector<2x64xf32>
    %174 = arith.addf %173, %172 : vector<2x64xf32>
    %175 = arith.divf %173, %174 : vector<2x64xf32>
    %176 = arith.mulf %167, %117 : vector<2x64xf32>
    %177 = arith.mulf %161, %169 : vector<2x64xf32>
    %178 = arith.addf %176, %177 : vector<2x64xf32>
    %179 = math.tanh %178 : vector<2x64xf32>
    %180 = arith.mulf %175, %179 : vector<2x64xf32>
    %181 = vector.extract_strided_slice %51 {offsets = [4, 0], sizes = [2, 64], strides = [1, 1]} : vector<16x64xf32> to vector<2x64xf32>
    %cst_51 = arith.constant dense<0.000000e+00> : vector<2x256xf32>
    %182 = tpu.matmul %181, %52, %cst_51 {dimension_numbers = #tpu.dot_dimension_numbers<[1], [0], [0], [1], [0, 0, 1, 1], [], []>} : vector<2x64xf32>, vector<64x256xf32>, vector<2x256xf32> -> vector<2x256xf32>
    %cst_52 = arith.constant dense<0.000000e+00> : vector<2x256xf32>
    %183 = tpu.matmul %150, %53, %cst_52 {dimension_numbers = #tpu.dot_dimension_numbers<[1], [0], [0], [1], [0, 0, 1, 1], [], []>} : vector<2x64xf32>, vector<64x256xf32>, vector<2x256xf32> -> vector<2x256xf32>
    %184 = arith.addf %182, %183 : vector<2x256xf32>
    %185 = vector.broadcast %54 : vector<1x256xf32> to vector<2x256xf32>
    %186 = arith.addf %184, %185 : vector<2x256xf32>
    %187 = vector.extract_strided_slice %186 {offsets = [0, 0], sizes = [2, 64], strides = [1, 1]} : vector<2x256xf32> to vector<2x64xf32>
    %188 = arith.negf %187 : vector<2x64xf32>
    %189 = math.exp %188 : vector<2x64xf32>
    %cst_53 = arith.constant 1.000000e+00 : f32
    %190 = vector.broadcast %cst_53 : f32 to vector<2x64xf32>
    %191 = arith.addf %190, %189 : vector<2x64xf32>
    %192 = arith.divf %190, %191 : vector<2x64xf32>
    %193 = vector.extract_strided_slice %186 {offsets = [0, 64], sizes = [2, 64], strides = [1, 1]} : vector<2x256xf32> to vector<2x64xf32>
    %194 = arith.negf %193 : vector<2x64xf32>
    %195 = math.exp %194 : vector<2x64xf32>
    %cst_54 = arith.constant 1.000000e+00 : f32
    %196 = vector.broadcast %cst_54 : f32 to vector<2x64xf32>
    %197 = arith.addf %196, %195 : vector<2x64xf32>
    %198 = arith.divf %196, %197 : vector<2x64xf32>
    %199 = vector.extract_strided_slice %186 {offsets = [0, 128], sizes = [2, 64], strides = [1, 1]} : vector<2x256xf32> to vector<2x64xf32>
    %200 = math.tanh %199 : vector<2x64xf32>
    %201 = vector.extract_strided_slice %186 {offsets = [0, 192], sizes = [2, 64], strides = [1, 1]} : vector<2x256xf32> to vector<2x64xf32>
    %202 = arith.negf %201 : vector<2x64xf32>
    %203 = math.exp %202 : vector<2x64xf32>
    %cst_55 = arith.constant 1.000000e+00 : f32
    %204 = vector.broadcast %cst_55 : f32 to vector<2x64xf32>
    %205 = arith.addf %204, %203 : vector<2x64xf32>
    %206 = arith.divf %204, %205 : vector<2x64xf32>
    %207 = arith.mulf %198, %148 : vector<2x64xf32>
    %208 = arith.mulf %192, %200 : vector<2x64xf32>
    %209 = arith.addf %207, %208 : vector<2x64xf32>
    %210 = math.tanh %209 : vector<2x64xf32>
    %211 = arith.mulf %206, %210 : vector<2x64xf32>
    %cst_56 = arith.constant dense<0.000000e+00> : vector<2x256xf32>
    %212 = tpu.matmul %211, %55, %cst_56 {dimension_numbers = #tpu.dot_dimension_numbers<[1], [0], [0], [1], [0, 0, 1, 1], [], []>} : vector<2x64xf32>, vector<64x256xf32>, vector<2x256xf32> -> vector<2x256xf32>
    %cst_57 = arith.constant dense<0.000000e+00> : vector<2x256xf32>
    %213 = tpu.matmul %180, %56, %cst_57 {dimension_numbers = #tpu.dot_dimension_numbers<[1], [0], [0], [1], [0, 0, 1, 1], [], []>} : vector<2x64xf32>, vector<64x256xf32>, vector<2x256xf32> -> vector<2x256xf32>
    %214 = arith.addf %212, %213 : vector<2x256xf32>
    %215 = vector.broadcast %57 : vector<1x256xf32> to vector<2x256xf32>
    %216 = arith.addf %214, %215 : vector<2x256xf32>
    %217 = vector.extract_strided_slice %216 {offsets = [0, 0], sizes = [2, 64], strides = [1, 1]} : vector<2x256xf32> to vector<2x64xf32>
    %218 = arith.negf %217 : vector<2x64xf32>
    %219 = math.exp %218 : vector<2x64xf32>
    %cst_58 = arith.constant 1.000000e+00 : f32
    %220 = vector.broadcast %cst_58 : f32 to vector<2x64xf32>
    %221 = arith.addf %220, %219 : vector<2x64xf32>
    %222 = arith.divf %220, %221 : vector<2x64xf32>
    %223 = vector.extract_strided_slice %216 {offsets = [0, 64], sizes = [2, 64], strides = [1, 1]} : vector<2x256xf32> to vector<2x64xf32>
    %224 = arith.negf %223 : vector<2x64xf32>
    %225 = math.exp %224 : vector<2x64xf32>
    %cst_59 = arith.constant 1.000000e+00 : f32
    %226 = vector.broadcast %cst_59 : f32 to vector<2x64xf32>
    %227 = arith.addf %226, %225 : vector<2x64xf32>
    %228 = arith.divf %226, %227 : vector<2x64xf32>
    %229 = vector.extract_strided_slice %216 {offsets = [0, 128], sizes = [2, 64], strides = [1, 1]} : vector<2x256xf32> to vector<2x64xf32>
    %230 = math.tanh %229 : vector<2x64xf32>
    %231 = vector.extract_strided_slice %216 {offsets = [0, 192], sizes = [2, 64], strides = [1, 1]} : vector<2x256xf32> to vector<2x64xf32>
    %232 = arith.negf %231 : vector<2x64xf32>
    %233 = math.exp %232 : vector<2x64xf32>
    %cst_60 = arith.constant 1.000000e+00 : f32
    %234 = vector.broadcast %cst_60 : f32 to vector<2x64xf32>
    %235 = arith.addf %234, %233 : vector<2x64xf32>
    %236 = arith.divf %234, %235 : vector<2x64xf32>
    %237 = arith.mulf %228, %178 : vector<2x64xf32>
    %238 = arith.mulf %222, %230 : vector<2x64xf32>
    %239 = arith.addf %237, %238 : vector<2x64xf32>
    %240 = math.tanh %239 : vector<2x64xf32>
    %241 = arith.mulf %236, %240 : vector<2x64xf32>
    %242 = vector.extract_strided_slice %51 {offsets = [6, 0], sizes = [2, 64], strides = [1, 1]} : vector<16x64xf32> to vector<2x64xf32>
    %cst_61 = arith.constant dense<0.000000e+00> : vector<2x256xf32>
    %243 = tpu.matmul %242, %52, %cst_61 {dimension_numbers = #tpu.dot_dimension_numbers<[1], [0], [0], [1], [0, 0, 1, 1], [], []>} : vector<2x64xf32>, vector<64x256xf32>, vector<2x256xf32> -> vector<2x256xf32>
    %cst_62 = arith.constant dense<0.000000e+00> : vector<2x256xf32>
    %244 = tpu.matmul %211, %53, %cst_62 {dimension_numbers = #tpu.dot_dimension_numbers<[1], [0], [0], [1], [0, 0, 1, 1], [], []>} : vector<2x64xf32>, vector<64x256xf32>, vector<2x256xf32> -> vector<2x256xf32>
    %245 = arith.addf %243, %244 : vector<2x256xf32>
    %246 = vector.broadcast %54 : vector<1x256xf32> to vector<2x256xf32>
    %247 = arith.addf %245, %246 : vector<2x256xf32>
    %248 = vector.extract_strided_slice %247 {offsets = [0, 0], sizes = [2, 64], strides = [1, 1]} : vector<2x256xf32> to vector<2x64xf32>
    %249 = arith.negf %248 : vector<2x64xf32>
    %250 = math.exp %249 : vector<2x64xf32>
    %cst_63 = arith.constant 1.000000e+00 : f32
    %251 = vector.broadcast %cst_63 : f32 to vector<2x64xf32>
    %252 = arith.addf %251, %250 : vector<2x64xf32>
    %253 = arith.divf %251, %252 : vector<2x64xf32>
    %254 = vector.extract_strided_slice %247 {offsets = [0, 64], sizes = [2, 64], strides = [1, 1]} : vector<2x256xf32> to vector<2x64xf32>
    %255 = arith.negf %254 : vector<2x64xf32>
    %256 = math.exp %255 : vector<2x64xf32>
    %cst_64 = arith.constant 1.000000e+00 : f32
    %257 = vector.broadcast %cst_64 : f32 to vector<2x64xf32>
    %258 = arith.addf %257, %256 : vector<2x64xf32>
    %259 = arith.divf %257, %258 : vector<2x64xf32>
    %260 = vector.extract_strided_slice %247 {offsets = [0, 128], sizes = [2, 64], strides = [1, 1]} : vector<2x256xf32> to vector<2x64xf32>
    %261 = math.tanh %260 : vector<2x64xf32>
    %262 = vector.extract_strided_slice %247 {offsets = [0, 192], sizes = [2, 64], strides = [1, 1]} : vector<2x256xf32> to vector<2x64xf32>
    %263 = arith.negf %262 : vector<2x64xf32>
    %264 = math.exp %263 : vector<2x64xf32>
    %cst_65 = arith.constant 1.000000e+00 : f32
    %265 = vector.broadcast %cst_65 : f32 to vector<2x64xf32>
    %266 = arith.addf %265, %264 : vector<2x64xf32>
    %267 = arith.divf %265, %266 : vector<2x64xf32>
    %268 = arith.mulf %259, %209 : vector<2x64xf32>
    %269 = arith.mulf %253, %261 : vector<2x64xf32>
    %270 = arith.addf %268, %269 : vector<2x64xf32>
    %271 = math.tanh %270 : vector<2x64xf32>
    %272 = arith.mulf %267, %271 : vector<2x64xf32>
    %cst_66 = arith.constant dense<0.000000e+00> : vector<2x256xf32>
    %273 = tpu.matmul %272, %55, %cst_66 {dimension_numbers = #tpu.dot_dimension_numbers<[1], [0], [0], [1], [0, 0, 1, 1], [], []>} : vector<2x64xf32>, vector<64x256xf32>, vector<2x256xf32> -> vector<2x256xf32>
    %cst_67 = arith.constant dense<0.000000e+00> : vector<2x256xf32>
    %274 = tpu.matmul %241, %56, %cst_67 {dimension_numbers = #tpu.dot_dimension_numbers<[1], [0], [0], [1], [0, 0, 1, 1], [], []>} : vector<2x64xf32>, vector<64x256xf32>, vector<2x256xf32> -> vector<2x256xf32>
    %275 = arith.addf %273, %274 : vector<2x256xf32>
    %276 = vector.broadcast %57 : vector<1x256xf32> to vector<2x256xf32>
    %277 = arith.addf %275, %276 : vector<2x256xf32>
    %278 = vector.extract_strided_slice %277 {offsets = [0, 0], sizes = [2, 64], strides = [1, 1]} : vector<2x256xf32> to vector<2x64xf32>
    %279 = arith.negf %278 : vector<2x64xf32>
    %280 = math.exp %279 : vector<2x64xf32>
    %cst_68 = arith.constant 1.000000e+00 : f32
    %281 = vector.broadcast %cst_68 : f32 to vector<2x64xf32>
    %282 = arith.addf %281, %280 : vector<2x64xf32>
    %283 = arith.divf %281, %282 : vector<2x64xf32>
    %284 = vector.extract_strided_slice %277 {offsets = [0, 64], sizes = [2, 64], strides = [1, 1]} : vector<2x256xf32> to vector<2x64xf32>
    %285 = arith.negf %284 : vector<2x64xf32>
    %286 = math.exp %285 : vector<2x64xf32>
    %cst_69 = arith.constant 1.000000e+00 : f32
    %287 = vector.broadcast %cst_69 : f32 to vector<2x64xf32>
    %288 = arith.addf %287, %286 : vector<2x64xf32>
    %289 = arith.divf %287, %288 : vector<2x64xf32>
    %290 = vector.extract_strided_slice %277 {offsets = [0, 128], sizes = [2, 64], strides = [1, 1]} : vector<2x256xf32> to vector<2x64xf32>
    %291 = math.tanh %290 : vector<2x64xf32>
    %292 = vector.extract_strided_slice %277 {offsets = [0, 192], sizes = [2, 64], strides = [1, 1]} : vector<2x256xf32> to vector<2x64xf32>
    %293 = arith.negf %292 : vector<2x64xf32>
    %294 = math.exp %293 : vector<2x64xf32>
    %cst_70 = arith.constant 1.000000e+00 : f32
    %295 = vector.broadcast %cst_70 : f32 to vector<2x64xf32>
    %296 = arith.addf %295, %294 : vector<2x64xf32>
    %297 = arith.divf %295, %296 : vector<2x64xf32>
    %298 = arith.mulf %289, %239 : vector<2x64xf32>
    %299 = arith.mulf %283, %291 : vector<2x64xf32>
    %300 = arith.addf %298, %299 : vector<2x64xf32>
    %301 = math.tanh %300 : vector<2x64xf32>
    %302 = arith.mulf %297, %301 : vector<2x64xf32>
    %303 = vector.extract_strided_slice %51 {offsets = [8, 0], sizes = [2, 64], strides = [1, 1]} : vector<16x64xf32> to vector<2x64xf32>
    %cst_71 = arith.constant dense<0.000000e+00> : vector<2x256xf32>
    %304 = tpu.matmul %303, %52, %cst_71 {dimension_numbers = #tpu.dot_dimension_numbers<[1], [0], [0], [1], [0, 0, 1, 1], [], []>} : vector<2x64xf32>, vector<64x256xf32>, vector<2x256xf32> -> vector<2x256xf32>
    %cst_72 = arith.constant dense<0.000000e+00> : vector<2x256xf32>
    %305 = tpu.matmul %272, %53, %cst_72 {dimension_numbers = #tpu.dot_dimension_numbers<[1], [0], [0], [1], [0, 0, 1, 1], [], []>} : vector<2x64xf32>, vector<64x256xf32>, vector<2x256xf32> -> vector<2x256xf32>
    %306 = arith.addf %304, %305 : vector<2x256xf32>
    %307 = vector.broadcast %54 : vector<1x256xf32> to vector<2x256xf32>
    %308 = arith.addf %306, %307 : vector<2x256xf32>
    %309 = vector.extract_strided_slice %308 {offsets = [0, 0], sizes = [2, 64], strides = [1, 1]} : vector<2x256xf32> to vector<2x64xf32>
    %310 = arith.negf %309 : vector<2x64xf32>
    %311 = math.exp %310 : vector<2x64xf32>
    %cst_73 = arith.constant 1.000000e+00 : f32
    %312 = vector.broadcast %cst_73 : f32 to vector<2x64xf32>
    %313 = arith.addf %312, %311 : vector<2x64xf32>
    %314 = arith.divf %312, %313 : vector<2x64xf32>
    %315 = vector.extract_strided_slice %308 {offsets = [0, 64], sizes = [2, 64], strides = [1, 1]} : vector<2x256xf32> to vector<2x64xf32>
    %316 = arith.negf %315 : vector<2x64xf32>
    %317 = math.exp %316 : vector<2x64xf32>
    %cst_74 = arith.constant 1.000000e+00 : f32
    %318 = vector.broadcast %cst_74 : f32 to vector<2x64xf32>
    %319 = arith.addf %318, %317 : vector<2x64xf32>
    %320 = arith.divf %318, %319 : vector<2x64xf32>
    %321 = vector.extract_strided_slice %308 {offsets = [0, 128], sizes = [2, 64], strides = [1, 1]} : vector<2x256xf32> to vector<2x64xf32>
    %322 = math.tanh %321 : vector<2x64xf32>
    %323 = vector.extract_strided_slice %308 {offsets = [0, 192], sizes = [2, 64], strides = [1, 1]} : vector<2x256xf32> to vector<2x64xf32>
    %324 = arith.negf %323 : vector<2x64xf32>
    %325 = math.exp %324 : vector<2x64xf32>
    %cst_75 = arith.constant 1.000000e+00 : f32
    %326 = vector.broadcast %cst_75 : f32 to vector<2x64xf32>
    %327 = arith.addf %326, %325 : vector<2x64xf32>
    %328 = arith.divf %326, %327 : vector<2x64xf32>
    %329 = arith.mulf %320, %270 : vector<2x64xf32>
    %330 = arith.mulf %314, %322 : vector<2x64xf32>
    %331 = arith.addf %329, %330 : vector<2x64xf32>
    %332 = math.tanh %331 : vector<2x64xf32>
    %333 = arith.mulf %328, %332 : vector<2x64xf32>
    %cst_76 = arith.constant dense<0.000000e+00> : vector<2x256xf32>
    %334 = tpu.matmul %333, %55, %cst_76 {dimension_numbers = #tpu.dot_dimension_numbers<[1], [0], [0], [1], [0, 0, 1, 1], [], []>} : vector<2x64xf32>, vector<64x256xf32>, vector<2x256xf32> -> vector<2x256xf32>
    %cst_77 = arith.constant dense<0.000000e+00> : vector<2x256xf32>
    %335 = tpu.matmul %302, %56, %cst_77 {dimension_numbers = #tpu.dot_dimension_numbers<[1], [0], [0], [1], [0, 0, 1, 1], [], []>} : vector<2x64xf32>, vector<64x256xf32>, vector<2x256xf32> -> vector<2x256xf32>
    %336 = arith.addf %334, %335 : vector<2x256xf32>
    %337 = vector.broadcast %57 : vector<1x256xf32> to vector<2x256xf32>
    %338 = arith.addf %336, %337 : vector<2x256xf32>
    %339 = vector.extract_strided_slice %338 {offsets = [0, 0], sizes = [2, 64], strides = [1, 1]} : vector<2x256xf32> to vector<2x64xf32>
    %340 = arith.negf %339 : vector<2x64xf32>
    %341 = math.exp %340 : vector<2x64xf32>
    %cst_78 = arith.constant 1.000000e+00 : f32
    %342 = vector.broadcast %cst_78 : f32 to vector<2x64xf32>
    %343 = arith.addf %342, %341 : vector<2x64xf32>
    %344 = arith.divf %342, %343 : vector<2x64xf32>
    %345 = vector.extract_strided_slice %338 {offsets = [0, 64], sizes = [2, 64], strides = [1, 1]} : vector<2x256xf32> to vector<2x64xf32>
    %346 = arith.negf %345 : vector<2x64xf32>
    %347 = math.exp %346 : vector<2x64xf32>
    %cst_79 = arith.constant 1.000000e+00 : f32
    %348 = vector.broadcast %cst_79 : f32 to vector<2x64xf32>
    %349 = arith.addf %348, %347 : vector<2x64xf32>
    %350 = arith.divf %348, %349 : vector<2x64xf32>
    %351 = vector.extract_strided_slice %338 {offsets = [0, 128], sizes = [2, 64], strides = [1, 1]} : vector<2x256xf32> to vector<2x64xf32>
    %352 = math.tanh %351 : vector<2x64xf32>
    %353 = vector.extract_strided_slice %338 {offsets = [0, 192], sizes = [2, 64], strides = [1, 1]} : vector<2x256xf32> to vector<2x64xf32>
    %354 = arith.negf %353 : vector<2x64xf32>
    %355 = math.exp %354 : vector<2x64xf32>
    %cst_80 = arith.constant 1.000000e+00 : f32
    %356 = vector.broadcast %cst_80 : f32 to vector<2x64xf32>
    %357 = arith.addf %356, %355 : vector<2x64xf32>
    %358 = arith.divf %356, %357 : vector<2x64xf32>
    %359 = arith.mulf %350, %300 : vector<2x64xf32>
    %360 = arith.mulf %344, %352 : vector<2x64xf32>
    %361 = arith.addf %359, %360 : vector<2x64xf32>
    %362 = math.tanh %361 : vector<2x64xf32>
    %363 = arith.mulf %358, %362 : vector<2x64xf32>
    %364 = vector.extract_strided_slice %51 {offsets = [10, 0], sizes = [2, 64], strides = [1, 1]} : vector<16x64xf32> to vector<2x64xf32>
    %cst_81 = arith.constant dense<0.000000e+00> : vector<2x256xf32>
    %365 = tpu.matmul %364, %52, %cst_81 {dimension_numbers = #tpu.dot_dimension_numbers<[1], [0], [0], [1], [0, 0, 1, 1], [], []>} : vector<2x64xf32>, vector<64x256xf32>, vector<2x256xf32> -> vector<2x256xf32>
    %cst_82 = arith.constant dense<0.000000e+00> : vector<2x256xf32>
    %366 = tpu.matmul %333, %53, %cst_82 {dimension_numbers = #tpu.dot_dimension_numbers<[1], [0], [0], [1], [0, 0, 1, 1], [], []>} : vector<2x64xf32>, vector<64x256xf32>, vector<2x256xf32> -> vector<2x256xf32>
    %367 = arith.addf %365, %366 : vector<2x256xf32>
    %368 = vector.broadcast %54 : vector<1x256xf32> to vector<2x256xf32>
    %369 = arith.addf %367, %368 : vector<2x256xf32>
    %370 = vector.extract_strided_slice %369 {offsets = [0, 0], sizes = [2, 64], strides = [1, 1]} : vector<2x256xf32> to vector<2x64xf32>
    %371 = arith.negf %370 : vector<2x64xf32>
    %372 = math.exp %371 : vector<2x64xf32>
    %cst_83 = arith.constant 1.000000e+00 : f32
    %373 = vector.broadcast %cst_83 : f32 to vector<2x64xf32>
    %374 = arith.addf %373, %372 : vector<2x64xf32>
    %375 = arith.divf %373, %374 : vector<2x64xf32>
    %376 = vector.extract_strided_slice %369 {offsets = [0, 64], sizes = [2, 64], strides = [1, 1]} : vector<2x256xf32> to vector<2x64xf32>
    %377 = arith.negf %376 : vector<2x64xf32>
    %378 = math.exp %377 : vector<2x64xf32>
    %cst_84 = arith.constant 1.000000e+00 : f32
    %379 = vector.broadcast %cst_84 : f32 to vector<2x64xf32>
    %380 = arith.addf %379, %378 : vector<2x64xf32>
    %381 = arith.divf %379, %380 : vector<2x64xf32>
    %382 = vector.extract_strided_slice %369 {offsets = [0, 128], sizes = [2, 64], strides = [1, 1]} : vector<2x256xf32> to vector<2x64xf32>
    %383 = math.tanh %382 : vector<2x64xf32>
    %384 = vector.extract_strided_slice %369 {offsets = [0, 192], sizes = [2, 64], strides = [1, 1]} : vector<2x256xf32> to vector<2x64xf32>
    %385 = arith.negf %384 : vector<2x64xf32>
    %386 = math.exp %385 : vector<2x64xf32>
    %cst_85 = arith.constant 1.000000e+00 : f32
    %387 = vector.broadcast %cst_85 : f32 to vector<2x64xf32>
    %388 = arith.addf %387, %386 : vector<2x64xf32>
    %389 = arith.divf %387, %388 : vector<2x64xf32>
    %390 = arith.mulf %381, %331 : vector<2x64xf32>
    %391 = arith.mulf %375, %383 : vector<2x64xf32>
    %392 = arith.addf %390, %391 : vector<2x64xf32>
    %393 = math.tanh %392 : vector<2x64xf32>
    %394 = arith.mulf %389, %393 : vector<2x64xf32>
    %cst_86 = arith.constant dense<0.000000e+00> : vector<2x256xf32>
    %395 = tpu.matmul %394, %55, %cst_86 {dimension_numbers = #tpu.dot_dimension_numbers<[1], [0], [0], [1], [0, 0, 1, 1], [], []>} : vector<2x64xf32>, vector<64x256xf32>, vector<2x256xf32> -> vector<2x256xf32>
    %cst_87 = arith.constant dense<0.000000e+00> : vector<2x256xf32>
    %396 = tpu.matmul %363, %56, %cst_87 {dimension_numbers = #tpu.dot_dimension_numbers<[1], [0], [0], [1], [0, 0, 1, 1], [], []>} : vector<2x64xf32>, vector<64x256xf32>, vector<2x256xf32> -> vector<2x256xf32>
    %397 = arith.addf %395, %396 : vector<2x256xf32>
    %398 = vector.broadcast %57 : vector<1x256xf32> to vector<2x256xf32>
    %399 = arith.addf %397, %398 : vector<2x256xf32>
    %400 = vector.extract_strided_slice %399 {offsets = [0, 0], sizes = [2, 64], strides = [1, 1]} : vector<2x256xf32> to vector<2x64xf32>
    %401 = arith.negf %400 : vector<2x64xf32>
    %402 = math.exp %401 : vector<2x64xf32>
    %cst_88 = arith.constant 1.000000e+00 : f32
    %403 = vector.broadcast %cst_88 : f32 to vector<2x64xf32>
    %404 = arith.addf %403, %402 : vector<2x64xf32>
    %405 = arith.divf %403, %404 : vector<2x64xf32>
    %406 = vector.extract_strided_slice %399 {offsets = [0, 64], sizes = [2, 64], strides = [1, 1]} : vector<2x256xf32> to vector<2x64xf32>
    %407 = arith.negf %406 : vector<2x64xf32>
    %408 = math.exp %407 : vector<2x64xf32>
    %cst_89 = arith.constant 1.000000e+00 : f32
    %409 = vector.broadcast %cst_89 : f32 to vector<2x64xf32>
    %410 = arith.addf %409, %408 : vector<2x64xf32>
    %411 = arith.divf %409, %410 : vector<2x64xf32>
    %412 = vector.extract_strided_slice %399 {offsets = [0, 128], sizes = [2, 64], strides = [1, 1]} : vector<2x256xf32> to vector<2x64xf32>
    %413 = math.tanh %412 : vector<2x64xf32>
    %414 = vector.extract_strided_slice %399 {offsets = [0, 192], sizes = [2, 64], strides = [1, 1]} : vector<2x256xf32> to vector<2x64xf32>
    %415 = arith.negf %414 : vector<2x64xf32>
    %416 = math.exp %415 : vector<2x64xf32>
    %cst_90 = arith.constant 1.000000e+00 : f32
    %417 = vector.broadcast %cst_90 : f32 to vector<2x64xf32>
    %418 = arith.addf %417, %416 : vector<2x64xf32>
    %419 = arith.divf %417, %418 : vector<2x64xf32>
    %420 = arith.mulf %411, %361 : vector<2x64xf32>
    %421 = arith.mulf %405, %413 : vector<2x64xf32>
    %422 = arith.addf %420, %421 : vector<2x64xf32>
    %423 = math.tanh %422 : vector<2x64xf32>
    %424 = arith.mulf %419, %423 : vector<2x64xf32>
    %425 = vector.extract_strided_slice %51 {offsets = [12, 0], sizes = [2, 64], strides = [1, 1]} : vector<16x64xf32> to vector<2x64xf32>
    %cst_91 = arith.constant dense<0.000000e+00> : vector<2x256xf32>
    %426 = tpu.matmul %425, %52, %cst_91 {dimension_numbers = #tpu.dot_dimension_numbers<[1], [0], [0], [1], [0, 0, 1, 1], [], []>} : vector<2x64xf32>, vector<64x256xf32>, vector<2x256xf32> -> vector<2x256xf32>
    %cst_92 = arith.constant dense<0.000000e+00> : vector<2x256xf32>
    %427 = tpu.matmul %394, %53, %cst_92 {dimension_numbers = #tpu.dot_dimension_numbers<[1], [0], [0], [1], [0, 0, 1, 1], [], []>} : vector<2x64xf32>, vector<64x256xf32>, vector<2x256xf32> -> vector<2x256xf32>
    %428 = arith.addf %426, %427 : vector<2x256xf32>
    %429 = vector.broadcast %54 : vector<1x256xf32> to vector<2x256xf32>
    %430 = arith.addf %428, %429 : vector<2x256xf32>
    %431 = vector.extract_strided_slice %430 {offsets = [0, 0], sizes = [2, 64], strides = [1, 1]} : vector<2x256xf32> to vector<2x64xf32>
    %432 = arith.negf %431 : vector<2x64xf32>
    %433 = math.exp %432 : vector<2x64xf32>
    %cst_93 = arith.constant 1.000000e+00 : f32
    %434 = vector.broadcast %cst_93 : f32 to vector<2x64xf32>
    %435 = arith.addf %434, %433 : vector<2x64xf32>
    %436 = arith.divf %434, %435 : vector<2x64xf32>
    %437 = vector.extract_strided_slice %430 {offsets = [0, 64], sizes = [2, 64], strides = [1, 1]} : vector<2x256xf32> to vector<2x64xf32>
    %438 = arith.negf %437 : vector<2x64xf32>
    %439 = math.exp %438 : vector<2x64xf32>
    %cst_94 = arith.constant 1.000000e+00 : f32
    %440 = vector.broadcast %cst_94 : f32 to vector<2x64xf32>
    %441 = arith.addf %440, %439 : vector<2x64xf32>
    %442 = arith.divf %440, %441 : vector<2x64xf32>
    %443 = vector.extract_strided_slice %430 {offsets = [0, 128], sizes = [2, 64], strides = [1, 1]} : vector<2x256xf32> to vector<2x64xf32>
    %444 = math.tanh %443 : vector<2x64xf32>
    %445 = vector.extract_strided_slice %430 {offsets = [0, 192], sizes = [2, 64], strides = [1, 1]} : vector<2x256xf32> to vector<2x64xf32>
    %446 = arith.negf %445 : vector<2x64xf32>
    %447 = math.exp %446 : vector<2x64xf32>
    %cst_95 = arith.constant 1.000000e+00 : f32
    %448 = vector.broadcast %cst_95 : f32 to vector<2x64xf32>
    %449 = arith.addf %448, %447 : vector<2x64xf32>
    %450 = arith.divf %448, %449 : vector<2x64xf32>
    %451 = arith.mulf %442, %392 : vector<2x64xf32>
    %452 = arith.mulf %436, %444 : vector<2x64xf32>
    %453 = arith.addf %451, %452 : vector<2x64xf32>
    %454 = math.tanh %453 : vector<2x64xf32>
    %455 = arith.mulf %450, %454 : vector<2x64xf32>
    %cst_96 = arith.constant dense<0.000000e+00> : vector<2x256xf32>
    %456 = tpu.matmul %455, %55, %cst_96 {dimension_numbers = #tpu.dot_dimension_numbers<[1], [0], [0], [1], [0, 0, 1, 1], [], []>} : vector<2x64xf32>, vector<64x256xf32>, vector<2x256xf32> -> vector<2x256xf32>
    %cst_97 = arith.constant dense<0.000000e+00> : vector<2x256xf32>
    %457 = tpu.matmul %424, %56, %cst_97 {dimension_numbers = #tpu.dot_dimension_numbers<[1], [0], [0], [1], [0, 0, 1, 1], [], []>} : vector<2x64xf32>, vector<64x256xf32>, vector<2x256xf32> -> vector<2x256xf32>
    %458 = arith.addf %456, %457 : vector<2x256xf32>
    %459 = vector.broadcast %57 : vector<1x256xf32> to vector<2x256xf32>
    %460 = arith.addf %458, %459 : vector<2x256xf32>
    %461 = vector.extract_strided_slice %460 {offsets = [0, 0], sizes = [2, 64], strides = [1, 1]} : vector<2x256xf32> to vector<2x64xf32>
    %462 = arith.negf %461 : vector<2x64xf32>
    %463 = math.exp %462 : vector<2x64xf32>
    %cst_98 = arith.constant 1.000000e+00 : f32
    %464 = vector.broadcast %cst_98 : f32 to vector<2x64xf32>
    %465 = arith.addf %464, %463 : vector<2x64xf32>
    %466 = arith.divf %464, %465 : vector<2x64xf32>
    %467 = vector.extract_strided_slice %460 {offsets = [0, 64], sizes = [2, 64], strides = [1, 1]} : vector<2x256xf32> to vector<2x64xf32>
    %468 = arith.negf %467 : vector<2x64xf32>
    %469 = math.exp %468 : vector<2x64xf32>
    %cst_99 = arith.constant 1.000000e+00 : f32
    %470 = vector.broadcast %cst_99 : f32 to vector<2x64xf32>
    %471 = arith.addf %470, %469 : vector<2x64xf32>
    %472 = arith.divf %470, %471 : vector<2x64xf32>
    %473 = vector.extract_strided_slice %460 {offsets = [0, 128], sizes = [2, 64], strides = [1, 1]} : vector<2x256xf32> to vector<2x64xf32>
    %474 = math.tanh %473 : vector<2x64xf32>
    %475 = vector.extract_strided_slice %460 {offsets = [0, 192], sizes = [2, 64], strides = [1, 1]} : vector<2x256xf32> to vector<2x64xf32>
    %476 = arith.negf %475 : vector<2x64xf32>
    %477 = math.exp %476 : vector<2x64xf32>
    %cst_100 = arith.constant 1.000000e+00 : f32
    %478 = vector.broadcast %cst_100 : f32 to vector<2x64xf32>
    %479 = arith.addf %478, %477 : vector<2x64xf32>
    %480 = arith.divf %478, %479 : vector<2x64xf32>
    %481 = arith.mulf %472, %422 : vector<2x64xf32>
    %482 = arith.mulf %466, %474 : vector<2x64xf32>
    %483 = arith.addf %481, %482 : vector<2x64xf32>
    %484 = math.tanh %483 : vector<2x64xf32>
    %485 = arith.mulf %480, %484 : vector<2x64xf32>
    %486 = vector.extract_strided_slice %51 {offsets = [14, 0], sizes = [2, 64], strides = [1, 1]} : vector<16x64xf32> to vector<2x64xf32>
    %cst_101 = arith.constant dense<0.000000e+00> : vector<2x256xf32>
    %487 = tpu.matmul %486, %52, %cst_101 {dimension_numbers = #tpu.dot_dimension_numbers<[1], [0], [0], [1], [0, 0, 1, 1], [], []>} : vector<2x64xf32>, vector<64x256xf32>, vector<2x256xf32> -> vector<2x256xf32>
    %cst_102 = arith.constant dense<0.000000e+00> : vector<2x256xf32>
    %488 = tpu.matmul %455, %53, %cst_102 {dimension_numbers = #tpu.dot_dimension_numbers<[1], [0], [0], [1], [0, 0, 1, 1], [], []>} : vector<2x64xf32>, vector<64x256xf32>, vector<2x256xf32> -> vector<2x256xf32>
    %489 = arith.addf %487, %488 : vector<2x256xf32>
    %490 = vector.broadcast %54 : vector<1x256xf32> to vector<2x256xf32>
    %491 = arith.addf %489, %490 : vector<2x256xf32>
    %492 = vector.extract_strided_slice %491 {offsets = [0, 0], sizes = [2, 64], strides = [1, 1]} : vector<2x256xf32> to vector<2x64xf32>
    %493 = arith.negf %492 : vector<2x64xf32>
    %494 = math.exp %493 : vector<2x64xf32>
    %cst_103 = arith.constant 1.000000e+00 : f32
    %495 = vector.broadcast %cst_103 : f32 to vector<2x64xf32>
    %496 = arith.addf %495, %494 : vector<2x64xf32>
    %497 = arith.divf %495, %496 : vector<2x64xf32>
    %498 = vector.extract_strided_slice %491 {offsets = [0, 64], sizes = [2, 64], strides = [1, 1]} : vector<2x256xf32> to vector<2x64xf32>
    %499 = arith.negf %498 : vector<2x64xf32>
    %500 = math.exp %499 : vector<2x64xf32>
    %cst_104 = arith.constant 1.000000e+00 : f32
    %501 = vector.broadcast %cst_104 : f32 to vector<2x64xf32>
    %502 = arith.addf %501, %500 : vector<2x64xf32>
    %503 = arith.divf %501, %502 : vector<2x64xf32>
    %504 = vector.extract_strided_slice %491 {offsets = [0, 128], sizes = [2, 64], strides = [1, 1]} : vector<2x256xf32> to vector<2x64xf32>
    %505 = math.tanh %504 : vector<2x64xf32>
    %506 = vector.extract_strided_slice %491 {offsets = [0, 192], sizes = [2, 64], strides = [1, 1]} : vector<2x256xf32> to vector<2x64xf32>
    %507 = arith.negf %506 : vector<2x64xf32>
    %508 = math.exp %507 : vector<2x64xf32>
    %cst_105 = arith.constant 1.000000e+00 : f32
    %509 = vector.broadcast %cst_105 : f32 to vector<2x64xf32>
    %510 = arith.addf %509, %508 : vector<2x64xf32>
    %511 = arith.divf %509, %510 : vector<2x64xf32>
    %512 = arith.mulf %503, %453 : vector<2x64xf32>
    %513 = arith.mulf %497, %505 : vector<2x64xf32>
    %514 = arith.addf %512, %513 : vector<2x64xf32>
    %515 = math.tanh %514 : vector<2x64xf32>
    %516 = arith.mulf %511, %515 : vector<2x64xf32>
    %cst_106 = arith.constant dense<0.000000e+00> : vector<2x256xf32>
    %517 = tpu.matmul %516, %55, %cst_106 {dimension_numbers = #tpu.dot_dimension_numbers<[1], [0], [0], [1], [0, 0, 1, 1], [], []>} : vector<2x64xf32>, vector<64x256xf32>, vector<2x256xf32> -> vector<2x256xf32>
    %cst_107 = arith.constant dense<0.000000e+00> : vector<2x256xf32>
    %518 = tpu.matmul %485, %56, %cst_107 {dimension_numbers = #tpu.dot_dimension_numbers<[1], [0], [0], [1], [0, 0, 1, 1], [], []>} : vector<2x64xf32>, vector<64x256xf32>, vector<2x256xf32> -> vector<2x256xf32>
    %519 = arith.addf %517, %518 : vector<2x256xf32>
    %520 = vector.broadcast %57 : vector<1x256xf32> to vector<2x256xf32>
    %521 = arith.addf %519, %520 : vector<2x256xf32>
    %522 = vector.extract_strided_slice %521 {offsets = [0, 0], sizes = [2, 64], strides = [1, 1]} : vector<2x256xf32> to vector<2x64xf32>
    %523 = arith.negf %522 : vector<2x64xf32>
    %524 = math.exp %523 : vector<2x64xf32>
    %cst_108 = arith.constant 1.000000e+00 : f32
    %525 = vector.broadcast %cst_108 : f32 to vector<2x64xf32>
    %526 = arith.addf %525, %524 : vector<2x64xf32>
    %527 = arith.divf %525, %526 : vector<2x64xf32>
    %528 = vector.extract_strided_slice %521 {offsets = [0, 64], sizes = [2, 64], strides = [1, 1]} : vector<2x256xf32> to vector<2x64xf32>
    %529 = arith.negf %528 : vector<2x64xf32>
    %530 = math.exp %529 : vector<2x64xf32>
    %cst_109 = arith.constant 1.000000e+00 : f32
    %531 = vector.broadcast %cst_109 : f32 to vector<2x64xf32>
    %532 = arith.addf %531, %530 : vector<2x64xf32>
    %533 = arith.divf %531, %532 : vector<2x64xf32>
    %534 = vector.extract_strided_slice %521 {offsets = [0, 128], sizes = [2, 64], strides = [1, 1]} : vector<2x256xf32> to vector<2x64xf32>
    %535 = math.tanh %534 : vector<2x64xf32>
    %536 = vector.extract_strided_slice %521 {offsets = [0, 192], sizes = [2, 64], strides = [1, 1]} : vector<2x256xf32> to vector<2x64xf32>
    %537 = arith.negf %536 : vector<2x64xf32>
    %538 = math.exp %537 : vector<2x64xf32>
    %cst_110 = arith.constant 1.000000e+00 : f32
    %539 = vector.broadcast %cst_110 : f32 to vector<2x64xf32>
    %540 = arith.addf %539, %538 : vector<2x64xf32>
    %541 = arith.divf %539, %540 : vector<2x64xf32>
    %542 = arith.mulf %533, %483 : vector<2x64xf32>
    %543 = arith.mulf %527, %535 : vector<2x64xf32>
    %544 = arith.addf %542, %543 : vector<2x64xf32>
    %545 = math.tanh %544 : vector<2x64xf32>
    %546 = arith.mulf %541, %545 : vector<2x64xf32>
    %547 = vector.extract_strided_slice %119 {offsets = [0, 0], sizes = [2, 32], strides = [1, 1]} : vector<2x64xf32> to vector<2x32xf32>
    %548 = vector.extract_strided_slice %241 {offsets = [0, 32], sizes = [2, 32], strides = [1, 1]} : vector<2x64xf32> to vector<2x32xf32>
    %549 = tpu.concatenate %547, %548 in 1 : vector<2x32xf32>, vector<2x32xf32> -> vector<2x64xf32>
    %550 = vector.extract_strided_slice %180 {offsets = [0, 0], sizes = [2, 32], strides = [1, 1]} : vector<2x64xf32> to vector<2x32xf32>
    %551 = vector.extract_strided_slice %302 {offsets = [0, 32], sizes = [2, 32], strides = [1, 1]} : vector<2x64xf32> to vector<2x32xf32>
    %552 = tpu.concatenate %550, %551 in 1 : vector<2x32xf32>, vector<2x32xf32> -> vector<2x64xf32>
    %553 = vector.extract_strided_slice %241 {offsets = [0, 0], sizes = [2, 32], strides = [1, 1]} : vector<2x64xf32> to vector<2x32xf32>
    %554 = vector.extract_strided_slice %363 {offsets = [0, 32], sizes = [2, 32], strides = [1, 1]} : vector<2x64xf32> to vector<2x32xf32>
    %555 = tpu.concatenate %553, %554 in 1 : vector<2x32xf32>, vector<2x32xf32> -> vector<2x64xf32>
    %556 = vector.extract_strided_slice %302 {offsets = [0, 0], sizes = [2, 32], strides = [1, 1]} : vector<2x64xf32> to vector<2x32xf32>
    %557 = vector.extract_strided_slice %424 {offsets = [0, 32], sizes = [2, 32], strides = [1, 1]} : vector<2x64xf32> to vector<2x32xf32>
    %558 = tpu.concatenate %556, %557 in 1 : vector<2x32xf32>, vector<2x32xf32> -> vector<2x64xf32>
    %559 = vector.extract_strided_slice %363 {offsets = [0, 0], sizes = [2, 32], strides = [1, 1]} : vector<2x64xf32> to vector<2x32xf32>
    %560 = vector.extract_strided_slice %485 {offsets = [0, 32], sizes = [2, 32], strides = [1, 1]} : vector<2x64xf32> to vector<2x32xf32>
    %561 = tpu.concatenate %559, %560 in 1 : vector<2x32xf32>, vector<2x32xf32> -> vector<2x64xf32>
    %562 = vector.extract_strided_slice %424 {offsets = [0, 0], sizes = [2, 32], strides = [1, 1]} : vector<2x64xf32> to vector<2x32xf32>
    %563 = vector.extract_strided_slice %546 {offsets = [0, 32], sizes = [2, 32], strides = [1, 1]} : vector<2x64xf32> to vector<2x32xf32>
    %564 = tpu.concatenate %562, %563 in 1 : vector<2x32xf32>, vector<2x32xf32> -> vector<2x64xf32>
    %565 = tpu.concatenate %549, %552, %555, %558, %561, %564 in 0 : vector<2x64xf32>, vector<2x64xf32>, vector<2x64xf32>, vector<2x64xf32>, vector<2x64xf32>, vector<2x64xf32> -> vector<12x64xf32>
    %c0_111 = arith.constant 0 : index
    %c0_112 = arith.constant 0 : index
    %566 = vector.load %arg13[%c0_111, %c0_112] : memref<64x128xf32, #tpu.memory_space<vmem>>, vector<64x128xf32>
    %cst_113 = arith.constant dense<0.000000e+00> : vector<12x128xf32>
    %567 = tpu.matmul %565, %566, %cst_113 {dimension_numbers = #tpu.dot_dimension_numbers<[1], [0], [0], [1], [0, 0, 1, 1], [], []>} : vector<12x64xf32>, vector<64x128xf32>, vector<12x128xf32> -> vector<12x128xf32>
    %c0_114 = arith.constant 0 : index
    %c0_115 = arith.constant 0 : index
    %568 = vector.load %arg14[%c0_114, %c0_115] : memref<1x128xf32, #tpu.memory_space<vmem>>, vector<1x128xf32>
    %569 = vector.broadcast %568 : vector<1x128xf32> to vector<12x128xf32>
    %570 = arith.addf %567, %569 : vector<12x128xf32>
    %c0_116 = arith.constant 0 : index
    %c0_117 = arith.constant 0 : index
    %571 = vector.load %arg15[%c0_116, %c0_117] : memref<12x128xf32, #tpu.memory_space<vmem>>, vector<12x128xf32>
    tpu.vector_store %arg15[%c0_116, %c0_117], %570 {strides = array<i32>} : memref<12x128xf32, #tpu.memory_space<vmem>>, vector<12x128xf32>,
    return
  }
}

</mosaic_0001>

<bundles_post_ra>
// kernel: language_model_forward.1
= control target key start
LH: loop header
LB: loop body
LE: loop exit
PB: predicated region body
PF: predicated region fallthrough
CT: control target
= control target key end

     0   :  { %v4709_v3 = vmov 0.0   ;;  %s4710_s16 = smov 64   ;;  %vm475_vm0 = vcmask 523264   ;;  %vm3517_vm1 = vcmask 261120   ;;  %vm3545_vm2 = vcmask 1041408   ;;  %s5996_s1 = inlined_call_operand.vmem [shape: f32[128,768], index: 1, kind: input, shape index: {}]   ;;  %s5997_s0 = inlined_call_operand.vmem [shape: f32[16,128], index: 0, kind: input, shape index: {}]   ;;  %s5998_s3 = inlined_call_operand.vmem [shape: f32[64,64], index: 3, kind: input, shape index: {}]   ;;  %s5999_s5 = inlined_call_operand.vmem [shape: f32[64,64], index: 5, kind: input, shape index: {}]   ;;  %s6000_s2 = inlined_call_operand.vmem [shape: f32[1,64], index: 2, kind: input, shape index: {}]   ;;  %s6001_s8 = inlined_call_operand.vmem [shape: f32[64,256], index: 8, kind: input, shape index: {}]   ;;  %s6002_s7 = inlined_call_operand.vmem [shape: f32[64,256], index: 7, kind: input, shape index: {}]   ;;  %s6003_s4 = inlined_call_operand.vmem [shape: f32[1,64], index: 4, kind: input, shape index: {}]   ;;  %s6004_s6 = inlined_call_operand.vmem [shape: f32[1,64], index: 6, kind: input, shape index: {}]   ;;  %s6005_s9 = inlined_call_operand.vmem [shape: f32[1,256], index: 9, kind: input, shape index: {}]   ;;  %s6006_s11 = inlined_call_operand.vmem [shape: f32[64,256], index: 11, kind: input, shape index: {}]   ;;  %s6007_s10 = inlined_call_operand.vmem [shape: f32[64,256], index: 10, kind: input, shape index: {}]   ;;  %s6008_s12 = inlined_call_operand.vmem [shape: f32[1,256], index: 12, kind: input, shape index: {}]   ;;  %s6009_s13 = inlined_call_operand.vmem [shape: f32[64,128], index: 13, kind: input, shape index: {}]   ;;  %s6010_s14 = inlined_call_operand.vmem [shape: f32[1,128], index: 14, kind: input, shape index: {}]   ;;  %s6011_s15 = inlined_call_operand.vmem [shape: f32[12,128], index: 15, kind: output, shape index: {}]  }
   0x1   :  { %v53_v0 = vld [vmem:[%s5996_s1 + $0x8] sm:$0xff]  ;;  %v59_v1 = vld [vmem:[%s5996_s1 + $0x38] sm:$0xff]  ;;  %v52_v2 = vld [vmem:[%s5996_s1] sm:$0xff]  ;;  %212 = vmatprep.mubr.f32.mxu0 %v4709_v3  ;;  %289 = vmatprep.mubr.f32.mxu1 %v4709_v3  ;;  %vm3547_vm3 = vcmask 1043456   ;;  %vm3549_vm4 = vcmask 1045504  }
   0x2   :  { %v3815_v4 = vpack.c.bf16 %v59_v1, %v53_v0  ;;  %v58_v5 = vld [vmem:[%s5996_s1 + $0x30] sm:$0xff]  ;;  %v65_v6 = vld [vmem:[%s5996_s1 + $0x68] sm:$0xff]  ;;  %v71_v7 = vld [vmem:[%s5996_s1 + $0x98] sm:$0xff] }
   0x3   :  { %v3817_v8 = vpack.c.bf16 %v58_v5, %v52_v2  ;;  %v3819_v9 = vpack.c.bf16 %v71_v7, %v65_v6  ;;  %v64_v10 = vld [vmem:[%s5996_s1 + $0x60] sm:$0xff]  ;;  %v70_v11 = vld [vmem:[%s5996_s1 + $0x90] sm:$0xff]  ;;  %v77_v12 = vld [vmem:[%s5996_s1 + $0xc8] sm:$0xff] }
   0x4   :  { %3816 = vmatprep.subr.bf16.mxu0 %v3815_v4  ;;  %v83_v13 = vld [vmem:[%s5996_s1 + $0xf8] sm:$0xff]  ;;  %v61_v15 = vld [vmem:[%s5996_s1 + $0x48] sm:$0xff]  ;;  %v3821_v16 = vpack.c.bf16 %v70_v11, %v64_v10  ;;  %v76_v18 = vld [vmem:[%s5996_s1 + $0xc0] sm:$0xff] }
   0x5   :  { %v55_v14 = vld [vmem:[%s5996_s1 + $0x18] sm:$0xff]  ;;  %3818 = vmatpush1.bf16.msra.mxu0 %v3817_v8  ;;  %v54_v19 = vld [vmem:[%s5996_s1 + $0x10] sm:$0xff]  ;;  %v3823_v20 = vpack.c.bf16 %v83_v13, %v77_v12  ;;  %v60_v22 = vld [vmem:[%s5996_s1 + $0x40] sm:$0xff] }
   0x6   :  { %v3847_v17 = vpack.c.bf16 %v61_v15, %v55_v14  ;;  %3820 = vmatprep.subr.bf16.mxu0 %v3819_v9  ;;  %v82_v21 = vld [vmem:[%s5996_s1 + $0xf0] sm:$0xff]  ;;  %v89_v23 = vld [vmem:[%s5996_s1 + $0x128] sm:$0xff]  ;;  %v3849_v24 = vpack.c.bf16 %v60_v22, %v54_v19  ;;  %v95_v25 = vld [vmem:[%s5996_s1 + $0x158] sm:$0xff] }
   0x7   :  { %v67_v26 = vld [vmem:[%s5996_s1 + $0x78] sm:$0xff]  ;;  %v73_v27 = vld [vmem:[%s5996_s1 + $0xa8] sm:$0xff]  ;;  %v66_v29 = vld [vmem:[%s5996_s1 + $0x70] sm:$0xff]  ;;  %v3825_v31 = vpack.c.bf16 %v82_v21, %v76_v18  ;;  %v3827_v35 = vpack.c.bf16 %v95_v25, %v89_v23 }
   0x8   :  { %3848 = vmatprep.subr.bf16.mxu1 %v3847_v17  ;;  %v3851_v28 = vpack.c.bf16 %v73_v27, %v67_v26  ;;  %v72_v30 = vld [vmem:[%s5996_s1 + $0xa0] sm:$0xff]  ;;  %v79_v34 = vld [vmem:[%s5996_s1 + $0xd8] sm:$0xff]  ;;  %v94_v36 = vld [vmem:[%s5996_s1 + $0x150] sm:$0xff] }
   0x9   :  { %3822 = vmatpush1.bf16.msra.mxu0 %v3821_v16  ;;  %3850 = vmatpush1.bf16.msra.mxu1 %v3849_v24  ;;  %v88_v32 = vld [vmem:[%s5996_s1 + $0x120] sm:$0xff]  ;;  %v3853_v33 = vpack.c.bf16 %v72_v30, %v66_v29  ;;  %v101_v37 = vld [vmem:[%s5996_s1 + $0x188] sm:$0xff]  ;;  %v107_v39 = vld [vmem:[%s5996_s1 + $0x1b8] sm:$0xff] }
   0xa   :  { %3824 = vmatprep.subr.bf16.mxu0 %v3823_v20  ;;  %3852 = vmatprep.subr.bf16.mxu1 %v3851_v28  ;;  %v85_v38 = vld [vmem:[%s5996_s1 + $0x108] sm:$0xff]  ;;  %v78_v41 = vld [vmem:[%s5996_s1 + $0xd0] sm:$0xff]  ;;  %v84_v42 = vld [vmem:[%s5996_s1 + $0x100] sm:$0xff]  ;;  %v3829_v45 = vpack.c.bf16 %v94_v36, %v88_v32  ;;  %v3831_v49 = vpack.c.bf16 %v107_v39, %v101_v37 }
   0xb   :  { %v3855_v40 = vpack.c.bf16 %v85_v38, %v79_v34  ;;  %v91_v43 = vld [vmem:[%s5996_s1 + $0x138] sm:$0xff]  ;;  %v97_v44 = vld [vmem:[%s5996_s1 + $0x168] sm:$0xff]  ;;  %v100_v46 = vld [vmem:[%s5996_s1 + $0x180] sm:$0xff]  ;;  %v3857_v48 = vpack.c.bf16 %v84_v42, %v78_v41 }
   0xc   :  { %v106_v47 = vld [vmem:[%s5996_s1 + $0x1b0] sm:$0xff]  ;;  %v113_v50 = vld [vmem:[%s5996_s1 + $0x1e8] sm:$0xff]  ;;  %v3859_v51 = vpack.c.bf16 %v97_v44, %v91_v43  ;;  %v96_v53 = vld [vmem:[%s5996_s1 + $0x160] sm:$0xff] }
   0xd   :  { %3826 = vmatpush1.bf16.msra.mxu0 %v3825_v31  ;;  %3854 = vmatpush1.bf16.msra.mxu1 %v3853_v33  ;;  %v90_v52 = vld [vmem:[%s5996_s1 + $0x130] sm:$0xff]  ;;  %v119_v54 = vld [vmem:[%s5996_s1 + $0x218] sm:$0xff]  ;;  %v109_v56 = vld [vmem:[%s5996_s1 + $0x1c8] sm:$0xff]  ;;  %v3833_v57 = vpack.c.bf16 %v106_v47, %v100_v46 }
   0xe   :  { %3828 = vmatprep.subr.bf16.mxu0 %v3827_v35  ;;  %3856 = vmatprep.subr.bf16.mxu1 %v3855_v40  ;;  %v103_v55 = vld [vmem:[%s5996_s1 + $0x198] sm:$0xff]  ;;  %v112_v58 = vld [vmem:[%s5996_s1 + $0x1e0] sm:$0xff]  ;;  %v118_v59 = vld [vmem:[%s5996_s1 + $0x210] sm:$0xff]  ;;  %v3861_v60 = vpack.c.bf16 %v96_v53, %v90_v52  ;;  %v3835_v61 = vpack.c.bf16 %v119_v54, %v113_v50 }
   0xf   :  { %v125_v62 = vld [vmem:[%s5996_s1 + $0x248] sm:$0xff]  ;;  %v3863_v63 = vpack.c.bf16 %v109_v56, %v103_v55  ;;  %v102_v0 = vld [vmem:[%s5996_s1 + $0x190] sm:$0xff]  ;;  %v108_v1 = vld [vmem:[%s5996_s1 + $0x1c0] sm:$0xff]  ;;  %v3837_v6 = vpack.c.bf16 %v118_v59, %v112_v58 }
  0x10   :  { %v131_v2 = vld [vmem:[%s5996_s1 + $0x278] sm:$0xff]  ;;  %v121_v5 = vld [vmem:[%s5996_s1 + $0x228] sm:$0xff]  ;;  %v124_v7 = vld [vmem:[%s5996_s1 + $0x240] sm:$0xff]  ;;  %v3865_v9 = vpack.c.bf16 %v108_v1, %v102_v0 }
  0x11   :  { %3830 = vmatpush1.bf16.msra.mxu0 %v3829_v45  ;;  %3858 = vmatpush1.bf16.msra.mxu1 %v3857_v48  ;;  %v115_v4 = vld [vmem:[%s5996_s1 + $0x1f8] sm:$0xff]  ;;  %v130_v8 = vld [vmem:[%s5996_s1 + $0x270] sm:$0xff]  ;;  %v3839_v10 = vpack.c.bf16 %v131_v2, %v125_v62  ;;  %v137_v11 = vld [vmem:[%s5996_s1 + $0x2a8] sm:$0xff] }
  0x12   :  { %3832 = vmatprep.subr.bf16.mxu0 %v3831_v49  ;;  %3860 = vmatprep.subr.bf16.mxu1 %v3859_v51  ;;  %v3867_v12 = vpack.c.bf16 %v121_v5, %v115_v4  ;;  %v114_v13 = vld [vmem:[%s5996_s1 + $0x1f0] sm:$0xff]  ;;  %v120_v14 = vld [vmem:[%s5996_s1 + $0x220] sm:$0xff]  ;;  %v143_v15 = vld [vmem:[%s5996_s1 + $0x2d8] sm:$0xff]  ;;  %v3841_v18 = vpack.c.bf16 %v130_v8, %v124_v7 }
  0x13   :  { %v127_v16 = vld [vmem:[%s5996_s1 + $0x258] sm:$0xff]  ;;  %v133_v17 = vld [vmem:[%s5996_s1 + $0x288] sm:$0xff]  ;;  %v136_v19 = vld [vmem:[%s5996_s1 + $0x2a0] sm:$0xff]  ;;  %v3869_v21 = vpack.c.bf16 %v120_v14, %v114_v13  ;;  %v3843_v22 = vpack.c.bf16 %v143_v15, %v137_v11 }
  0x14   :  { %v142_v20 = vld [vmem:[%s5996_s1 + $0x2d0] sm:$0xff]  ;;  %v3871_v23 = vpack.c.bf16 %v133_v17, %v127_v16  ;;  %v57_v24 = vld [vmem:[%s5996_s1 + $0x28] sm:$0xff]  ;;  %v132_v26 = vld [vmem:[%s5996_s1 + $0x280] sm:$0xff] }
  0x15   :  { %3834 = vmatpush1.bf16.msra.mxu0 %v3833_v57  ;;  %3862 = vmatpush1.bf16.msra.mxu1 %v3861_v60  ;;  %v126_v25 = vld [vmem:[%s5996_s1 + $0x250] sm:$0xff]  ;;  %v63_v27 = vld [vmem:[%s5996_s1 + $0x58] sm:$0xff]  ;;  %v145_v29 = vld [vmem:[%s5996_s1 + $0x2e8] sm:$0xff]  ;;  %v3845_v30 = vpack.c.bf16 %v142_v20, %v136_v19 }
  0x16   :  { %3836 = vmatprep.subr.bf16.mxu0 %v3835_v61  ;;  %3864 = vmatprep.subr.bf16.mxu1 %v3863_v63  ;;  %v139_v28 = vld [vmem:[%s5996_s1 + $0x2b8] sm:$0xff]  ;;  %v3873_v31 = vpack.c.bf16 %v132_v26, %v126_v25  ;;  %v3879_v32 = vpack.c.bf16 %v63_v27, %v57_v24  ;;  %v56_v33 = vld [vmem:[%s5996_s1 + $0x20] sm:$0xff]  ;;  %v62_v34 = vld [vmem:[%s5996_s1 + $0x50] sm:$0xff] }
  0x17   :  { %v3875_v35 = vpack.c.bf16 %v145_v29, %v139_v28  ;;  %v69_v36 = vld [vmem:[%s5996_s1 + $0x88] sm:$0xff]  ;;  %v75_v37 = vld [vmem:[%s5996_s1 + $0xb8] sm:$0xff]  ;;  %v138_v38 = vld [vmem:[%s5996_s1 + $0x2b0] sm:$0xff]  ;;  %v3881_v41 = vpack.c.bf16 %v62_v34, %v56_v33 }
  0x18   :  { %v144_v39 = vld [vmem:[%s5996_s1 + $0x2e0] sm:$0xff]  ;;  %v3883_v42 = vpack.c.bf16 %v75_v37, %v69_v36  ;;  %v74_v45 = vld [vmem:[%s5996_s1 + $0xb0] sm:$0xff]  ;;  %v81_v46 = vld [vmem:[%s5996_s1 + $0xe8] sm:$0xff] }
  0x19   :  { %3838 = vmatpush1.bf16.msra.mxu0 %v3837_v6  ;;  %3866 = vmatpush1.bf16.msra.mxu1 %v3865_v9  ;;  %v5006_v40 = vld [vmem:[%s5997_s0] sm:$0xff]  ;;  %v3877_v43 = vpack.c.bf16 %v144_v39, %v138_v38  ;;  %v87_v47 = vld [vmem:[%s5996_s1 + $0x118] sm:$0xff]  ;;  %v51_v48 = vld [vmem:[%s5997_s0 + $0x8] sm:$0xff] }
  0x1a   :  { %3840 = vmatprep.subr.bf16.mxu0 %v3839_v10  ;;  %3868 = vmatprep.subr.bf16.mxu1 %v3867_v12  ;;  %v68_v44 = vld [vmem:[%s5996_s1 + $0x80] sm:$0xff]  ;;  %v3887_v50 = vpack.c.bf16 %v87_v47, %v81_v46  ;;  %v86_v52 = vld [vmem:[%s5996_s1 + $0x110] sm:$0xff]  ;;  %v93_v53 = vld [vmem:[%s5996_s1 + $0x148] sm:$0xff] }
  0x1b   :  { %v3885_v49 = vpack.c.bf16 %v74_v45, %v68_v44  ;;  %v80_v51 = vld [vmem:[%s5996_s1 + $0xe0] sm:$0xff]  ;;  %v99_v54 = vld [vmem:[%s5996_s1 + $0x178] sm:$0xff]  ;;  %v98_v58 = vld [vmem:[%s5996_s1 + $0x170] sm:$0xff] }
  0x1c   :  { %v3889_v55 = vpack.c.bf16 %v86_v52, %v80_v51  ;;  %v3891_v56 = vpack.c.bf16 %v99_v54, %v93_v53  ;;  %v92_v57 = vld [vmem:[%s5996_s1 + $0x140] sm:$0xff]  ;;  %v105_v59 = vld [vmem:[%s5996_s1 + $0x1a8] sm:$0xff]  ;;  %v111_v60 = vld [vmem:[%s5996_s1 + $0x1d8] sm:$0xff] }
  0x1d   :  { %3842 = vmatpush1.bf16.msra.mxu0 %v3841_v18  ;;  %3870 = vmatpush1.bf16.msra.mxu1 %v3869_v21  ;;  %v3893_v61 = vpack.c.bf16 %v98_v58, %v92_v57  ;;  %v3895_v62 = vpack.c.bf16 %v111_v60, %v105_v59  ;;  %v104_v63 = vld [vmem:[%s5996_s1 + $0x1a0] sm:$0xff]  ;;  %v110_v0 = vld [vmem:[%s5996_s1 + $0x1d0] sm:$0xff]  ;;  %v117_v1 = vld [vmem:[%s5996_s1 + $0x208] sm:$0xff] }
  0x1e   :  { %3844 = vmatprep.subr.bf16.mxu0 %v3843_v22  ;;  %3872 = vmatprep.subr.bf16.mxu1 %v3871_v23  ;;  %v123_v2 = vld [vmem:[%s5996_s1 + $0x238] sm:$0xff]  ;;  %v3897_v4 = vpack.c.bf16 %v110_v0, %v104_v63  ;;  %v116_v6 = vld [vmem:[%s5996_s1 + $0x200] sm:$0xff]  ;;  %v122_v7 = vld [vmem:[%s5996_s1 + $0x230] sm:$0xff] }
  0x1f   :  { %v3899_v5 = vpack.c.bf16 %v123_v2, %v117_v1  ;;  %v129_v8 = vld [vmem:[%s5996_s1 + $0x268] sm:$0xff]  ;;  %v135_v9 = vld [vmem:[%s5996_s1 + $0x298] sm:$0xff]  ;;  %v3901_v10 = vpack.c.bf16 %v122_v7, %v116_v6  ;;  %v128_v12 = vld [vmem:[%s5996_s1 + $0x260] sm:$0xff] }
  0x20   :  { %v3903_v11 = vpack.c.bf16 %v135_v9, %v129_v8  ;;  %v134_v13 = vld [vmem:[%s5996_s1 + $0x290] sm:$0xff]  ;;  %v141_v14 = vld [vmem:[%s5996_s1 + $0x2c8] sm:$0xff]  ;;  %v147_v15 = vld [vmem:[%s5996_s1 + $0x2f8] sm:$0xff] }
  0x21   :  { %3846 = vmatpush1.bf16.msra.mxu0 %v3845_v30  ;;  %3874 = vmatpush1.bf16.msra.mxu1 %v3873_v31  ;;  %v3905_v16 = vpack.c.bf16 %v134_v13, %v128_v12  ;;  %v3907_v17 = vpack.c.bf16 %v147_v15, %v141_v14  ;;  %v140_v18 = vld [vmem:[%s5996_s1 + $0x2c0] sm:$0xff]  ;;  %v146_v19 = vld [vmem:[%s5996_s1 + $0x2f0] sm:$0xff]  ;;  %v461_v30 = vld [vmem:[%s5998_s3 + $0x8] sm:$0xff] }
  0x22   :  { %3880 = vmatprep.subr.bf16.mxu0 %v3879_v32  ;;  %3876 = vmatprep.subr.bf16.mxu1 %v3875_v35  ;;  %v3909_v20 = vpack.c.bf16 %v146_v19, %v140_v18  ;;  %v460_v29 = vld [vmem:[%s5998_s3] sm:$0xff]  ;;  %v462_v32 = vld [vmem:[%s5998_s3 + $0x10] sm:$0xff]  ;;  %v463_v33 = vld [vmem:[%s5998_s3 + $0x18] sm:$0xff] }
  0x23   :  { %v3911_v31 = vpack.c.bf16 %v461_v30, %v460_v29  ;;  %v3915_v34 = vpack.c.bf16 %v463_v33, %v462_v32  ;;  %v464_v35 = vld [vmem:[%s5998_s3 + $0x20] sm:$0xff]  ;;  %v465_v36 = vld [vmem:[%s5998_s3 + $0x28] sm:$0xff]  ;;  %v466_v39 = vld [vmem:[%s5998_s3 + $0x30] sm:$0xff] }
  0x24   :  { %213 = vmatmul.mubr.f32.vlgmr.msra.gmra.mrb[0].mxu0 %v5006_v40  ;;  %v3919_v38 = vpack.c.bf16 %v465_v36, %v464_v35  ;;  %v569_v45 = vld [vmem:[%s5999_s5] sm:$0xff]  ;;  %v570_v46 = vld [vmem:[%s5999_s5 + $0x8] sm:$0xff]  ;;  %v575_v30 = vld [vmem:[%s5999_s5 + $0x30] sm:$0xff] }
  0x25   :  { %3882 = vmatpush1.bf16.msra.mxu0 %v3881_v41  ;;  %218 = vmatprep.mubr.f32.mxu0 %v4709_v3  ;;  %v3927_v47 = vpack.c.bf16 %v570_v46, %v569_v45  ;;  %v3654_v12 = vld [vmem:[%s6000_s2] ss:$0 sm:$0xff]  ;;  %v686_v33 = vld [vmem:[%s6001_s8 + $0x8] sm:$0xff]  ;;  %v696_v46 = vld [vmem:[%s6001_s8 + $0x58] sm:$0xff] }
  0x26   :  { %3884 = vmatprep.subr.bf16.mxu0 %v3883_v42  ;;  %3878 = vmatpush1.bf16.msra.mxu1 %v3877_v43  ;;  %v685_v36 = vld [vmem:[%s6001_s8] sm:$0xff]  ;;  %v694_v45 = vld [vmem:[%s6001_s8 + $0x48] sm:$0xff] }
  0x27   :  { %3912 = vmatprep.subr.bf16.mxu1 %v3911_v31 }
  0x28   :  { %219 = vmatmul.mubr.f32.gmra.mrb[2].mxu0 %v51_v48 }
  0x29   :  { %3886 = vmatpush1.bf16.msra.mxu0 %v3885_v49  ;;  %290 = vmatmul.mubr.f32.vlgmr.msra.gmra.mrb[0].mxu1 %v5006_v40 }
  0x2a   :  { %3888 = vmatprep.subr.bf16.mxu0 %v3887_v50  ;;  %295 = vmatprep.mubr.f32.mxu1 %v4709_v3 }
  0x2b   :  { %366 = vmatprep.mubr.f32.mxu0 %v4709_v3  ;;  %3914 = vmatpush3.bf16.msra.mxu1 %v3911_v31  ;;  %v576_v31 = vld [vmem:[%s5999_s5 + $0x38] sm:$0xff] }
  0x2c   :  { %3916 = vmatprep.subr.bf16.mxu1 %v3915_v34  ;;  %v3939_v32 = vpack.c.bf16 %v576_v31, %v575_v30 }
  0x2d   :  { %3890 = vmatpush1.bf16.msra.mxu0 %v3889_v55  ;;  %296 = vmatmul.mubr.f32.gmra.mrb[2].mxu1 %v51_v48 }
  0x2e   :  { %3892 = vmatprep.subr.bf16.mxu0 %v3891_v56 }
  0x2f   :  { %3918 = vmatpush3.bf16.msra.mxu1 %v3915_v34  ;;  %v688_v34 = vld [vmem:[%s6001_s8 + $0x18] sm:$0xff] }
  0x30   :  { %3920 = vmatprep.subr.bf16.mxu1 %v3919_v38  ;;  %v5179_v35 = vpack.c.bf16 %v688_v34, %v686_v33 }
  0x31   :  { %3894 = vmatpush1.bf16.msra.mxu0 %v3893_v61 }
  0x32   :  { %3896 = vmatprep.subr.bf16.mxu0 %v3895_v62 }
  0x33   :  { %3922 = vmatpush3.bf16.msra.mxu1 %v3919_v38 }
  0x35   :  { %3898 = vmatpush1.bf16.msra.mxu0 %v3897_v4 }
  0x36   :  { %3900 = vmatprep.subr.bf16.mxu0 %v3899_v5 }
  0x39   :  { %3902 = vmatpush1.bf16.msra.mxu0 %v3901_v10 }
  0x3a   :  { %3904 = vmatprep.subr.bf16.mxu0 %v3903_v11 }
  0x3d   :  { %3906 = vmatpush1.bf16.msra.mxu0 %v3905_v16 }
  0x3e   :  { %3908 = vmatprep.subr.bf16.mxu0 %v3907_v17 }
  0x41   :  { %3910 = vmatpush1.bf16.msra.mxu0 %v3909_v20 }
  0x42   :  { %3944 = vmatprep.subr.bf16.mxu0 %v5179_v35 }
  0x44   :  { %367 = vmatmul.mubr.f32.vlgmr.msra.gmra.mrb[4].mxu0 %v5006_v40  ;;  %v467_v40 = vld [vmem:[%s5998_s3 + $0x38] sm:$0xff] }
  0x45   :  { %372 = vmatprep.mubr.f32.mxu0 %v4709_v3  ;;  %v3923_v42 = vpack.c.bf16 %v467_v40, %v466_v39  ;;  %v690_v39 = vld [vmem:[%s6001_s8 + $0x28] sm:$0xff]  ;;  %v692_v40 = vld [vmem:[%s6001_s8 + $0x38] sm:$0xff] }
  0x47   :  { %3924 = vmatprep.subr.bf16.mxu1 %v3923_v42 }
  0x48   :  { %373 = vmatmul.mubr.f32.gmra.mrb[6].mxu0 %v51_v48  ;;  %3926 = vmatpush3.bf16.msra.mxu1 %v3923_v42  ;;  %v689_v42 = vld [vmem:[%s6001_s8 + $0x20] sm:$0xff] }
  0x49   :  { %802 = vmatprep.mubr.f32.mxu0 %v4709_v3  ;;  %3928 = vmatprep.subr.bf16.mxu1 %v3927_v47 }
  0xf7   :  { %v214_v21 = vpop.f32.mrb[0].mxu0 }
  0xf8   :  { %381 = vrot.lane.b32.xlu0 %v214_v21, %s4710_s16  ;;  %v216_v22 = vpop.f32.mrb[1].mxu0 }
  0xf9   :  { %393 = vrot.lane.b32.xlu1 %v216_v22, %s4710_s16 }
  0xfb   :  { %v220_v23 = vpop.f32.mrb[2].mxu0 }
  0xfc   :  { %383 = vrot.lane.b32.xlu0 %v220_v23, %s4710_s16  ;;  %v222_v24 = vpop.f32.mrb[3].mxu0  ;;  %v291_v25 = vpop.f32.mrb[0].mxu1 }
  0xfd   :  { %395 = vrot.lane.b32.xlu1 %v222_v24, %s4710_s16  ;;  %v293_v26 = vpop.f32.mrb[1].mxu1 }
 0x100   :  { %405 = vrot.lane.b32.xlu0 %v291_v25, %s4710_s16  ;;  %v297_v27 = vpop.f32.mrb[2].mxu1 }
 0x101   :  { %407 = vrot.lane.b32.xlu1 %v297_v27, %s4710_s16  ;;  %v299_v28 = vpop.f32.mrb[3].mxu1 }
 0x104   :  { %417 = vrot.lane.b32.xlu0 %v293_v26, %s4710_s16 }
 0x105   :  { %419 = vrot.lane.b32.xlu1 %v299_v28, %s4710_s16 }
 0x117   :  { %v368_v37 = vpop.f32.mrb[4].mxu0 }
 0x118   :  { %429 = vrot.lane.b32.xlu0 %v368_v37, %s4710_s16  ;;  %v370_v41 = vpop.f32.mrb[5].mxu0 }
 0x11b   :  { %v374_v43 = vpop.f32.mrb[6].mxu0 }
 0x11c   :  { %441 = vrot.lane.b32.xlu0 %v370_v41, %s4710_s16  ;;  %431 = vrot.lane.b32.xlu1 %v374_v43, %s4710_s16  ;;  %v376_v44 = vpop.f32.mrb[7].mxu0 }
 0x120   :  { %443 = vrot.lane.b32.xlu1 %v376_v44, %s4710_s16 }
 0x16a   :  { %v382_v48 = vpop.permute.xlu0 %381 }
 0x16b   :  { %v387_v49 = vmax.f32 %v214_v21, %v382_v48  ;;  %v394_v50 = vpop.permute.xlu1 %393  ;;  %v693_v48 = vld [vmem:[%s6001_s8 + $0x40] sm:$0xff] }
 0x16d   :  { %v389_v51 = vmax.f32 %v387_v49, %v216_v22  ;;  %v695_v49 = vld [vmem:[%s6001_s8 + $0x50] sm:$0xff] }
 0x16e   :  { %v384_v52 = vpop.permute.xlu0 %383 }
 0x16f   :  { %v399_v53 = vmax.f32 %v389_v51, %v394_v50  ;;  %v388_v54 = vmax.f32 %v220_v23, %v384_v52  ;;  %v396_v55 = vpop.permute.xlu1 %395  ;;  %v571_v23 = vld [vmem:[%s5999_s5 + $0x10] sm:$0xff]  ;;  %v5223_v50 = vpack.c.bf16 %v695_v49, %v693_v48  ;;  %v698_v51 = vld [vmem:[%s6001_s8 + $0x68] sm:$0xff]  ;;  %v700_v52 = vld [vmem:[%s6001_s8 + $0x78] sm:$0xff] }
 0x171   :  { %v401_v56 = vmax.f32 %v399_v53, %v291_v25  ;;  %v390_v57 = vmax.f32 %v388_v54, %v222_v24  ;;  %v572_v24 = vld [vmem:[%s5999_s5 + $0x18] sm:$0xff]  ;;  %v5233_v53 = vpack.c.bf16 %v700_v52, %v698_v51  ;;  %v697_v54 = vld [vmem:[%s6001_s8 + $0x60] sm:$0xff] }
 0x172   :  { %v406_v58 = vpop.permute.xlu0 %405  ;;  %v3931_v25 = vpack.c.bf16 %v572_v24, %v571_v23 }
 0x173   :  { %v411_v59 = vmax.f32 %v401_v56, %v406_v58  ;;  %v400_v60 = vmax.f32 %v390_v57, %v396_v55  ;;  %v408_v61 = vpop.permute.xlu1 %407  ;;  %v699_v55 = vld [vmem:[%s6001_s8 + $0x70] sm:$0xff]  ;;  %v670_v57 = vld [vmem:[%s6002_s7 + $0x8] sm:$0xff]  ;;  %v672_v58 = vld [vmem:[%s6002_s7 + $0x18] sm:$0xff] }
 0x174   :  { %v5241_v56 = vpack.c.bf16 %v699_v55, %v697_v54 }
 0x175   :  { %v413_v62 = vmax.f32 %v411_v59, %v293_v26  ;;  %v402_v63 = vmax.f32 %v400_v60, %v297_v27  ;;  %v573_v27 = vld [vmem:[%s5999_s5 + $0x20] sm:$0xff]  ;;  %v5251_v59 = vpack.c.bf16 %v672_v58, %v670_v57 }
 0x176   :  { %v418_v0 = vpop.permute.xlu0 %417  ;;  %v669_v60 = vld [vmem:[%s6002_s7] sm:$0xff] }
 0x177   :  { %v423_v1 = vmax.f32 %v413_v62, %v418_v0  ;;  %v412_v2 = vmax.f32 %v402_v63, %v408_v61  ;;  %v420_v4 = vpop.permute.xlu1 %419  ;;  %v671_v61 = vld [vmem:[%s6002_s7 + $0x10] sm:$0xff]  ;;  %v674_v63 = vld [vmem:[%s6002_s7 + $0x28] sm:$0xff]  ;;  %v676_v0 = vld [vmem:[%s6002_s7 + $0x38] sm:$0xff] }
 0x178   :  { %v5259_v62 = vpack.c.bf16 %v671_v61, %v669_v60  ;;  %v701_v57 = vld [vmem:[%s6005_s9] sm:$0x3] }
 0x179   :  { %v414_v5 = vmax.f32 %v412_v2, %v299_v28  ;;  %v425_v6 = vmax.f32 %v423_v1, %v368_v37  ;;  %v574_v28 = vld [vmem:[%s5999_s5 + $0x28] sm:$0xff]  ;;  %v687_v37 = vld [vmem:[%s6001_s8 + $0x10] sm:$0xff]  ;;  %v5271_v1 = vpack.c.bf16 %v676_v0, %v674_v63  ;;  %v673_v2 = vld [vmem:[%s6002_s7 + $0x20] sm:$0xff] }
 0x17a   :  { %v3935_v29 = vpack.c.bf16 %v574_v28, %v573_v27  ;;  %v5187_v38 = vpack.c.bf16 %v687_v37, %v685_v36  ;;  %v3660_v27 = vld [vmem:[%s6004_s6] ss:$0 sm:$0xff] }
 0x17b   :  { %v424_v7 = vmax.f32 %v414_v5, %v420_v4  ;;  %v675_v4 = vld [vmem:[%s6002_s7 + $0x30] sm:$0xff] }
 0x17c   :  { %3946 = vmatpush1.bf16.msra.mxu0 %v5187_v38  ;;  %v5279_v5 = vpack.c.bf16 %v675_v4, %v673_v2 }
 0x17d   :  { %v426_v8 = vmax.f32 %v424_v7, %v374_v43  ;;  %v691_v43 = vld [vmem:[%s6001_s8 + $0x30] sm:$0xff]  ;;  %v680_v7 = vld [vmem:[%s6002_s7 + $0x58] sm:$0xff] }
 0x18a   :  { %v430_v9 = vpop.permute.xlu0 %429 }
 0x18b   :  { %v435_v10 = vmax.f32 %v425_v6, %v430_v9  ;;  %v678_v6 = vld [vmem:[%s6002_s7 + $0x48] sm:$0xff]  ;;  %v677_v9 = vld [vmem:[%s6002_s7 + $0x40] sm:$0xff] }
 0x18d   :  { %v437_v11 = vmax.f32 %v435_v10, %v370_v41  ;;  %v5197_v41 = vpack.c.bf16 %v692_v40, %v690_v39  ;;  %v679_v10 = vld [vmem:[%s6002_s7 + $0x50] sm:$0xff] }
 0x18e   :  { %v442_v13 = vpop.permute.xlu0 %441  ;;  %v432_v14 = vpop.permute.xlu1 %431 }
 0x18f   :  { %v447_v15 = vmax.f32 %v437_v11, %v442_v13  ;;  %v436_v16 = vmax.f32 %v426_v8, %v432_v14  ;;  %3948 = vmatprep.subr.bf16.mxu0 %v5197_v41  ;;  %v5289_v8 = vpack.c.bf16 %v680_v7, %v678_v6  ;;  %v5297_v11 = vpack.c.bf16 %v679_v10, %v677_v9  ;;  %v684_v13 = vld [vmem:[%s6002_s7 + $0x78] sm:$0xff] }
 0x191   :  { %v456_v17 = vadd.f32 %v3654_v12, %v447_v15  ;;  %v438_v18 = vmax.f32 %v436_v16, %v376_v44  ;;  %v5205_v44 = vpack.c.bf16 %v691_v43, %v689_v42  ;;  %v681_v15 = vld [vmem:[%s6002_s7 + $0x60] sm:$0xff]  ;;  %v683_v16 = vld [vmem:[%s6002_s7 + $0x70] sm:$0xff] }
 0x192   :  { %v444_v19 = vpop.permute.xlu1 %443 }
 0x193   :  { %4505 = vtanh.f32 %v456_v17  ;;  %v448_v20 = vmax.f32 %v438_v18, %v444_v19  ;;  %3950 = vmatpush1.bf16.msra.mxu0 %v5205_v44  ;;  %v5315_v17 = vpack.c.bf16 %v683_v16, %v681_v15  ;;  %v3655_v18 = vld [vmem:[%s6003_s4] ss:$0 sm:$0xff]  ;;  %v719_v15 = vld [vmem:[%s6006_s11 + $0x8] sm:$0xff]  ;;  %v721_v16 = vld [vmem:[%s6006_s11 + $0x18] sm:$0xff] }
 0x195   :  { %v457_v21 = vadd.f32 %v3654_v12, %v448_v20  ;;  %v682_v12 = vld [vmem:[%s6002_s7 + $0x68] sm:$0xff] }
 0x196   :  { %v5307_v14 = vpack.c.bf16 %v684_v13, %v682_v12 }
 0x197   :  { %4507 = vtanh.f32 %v457_v21 }
 0x19d   :  { %v5142_v22 = vpop.eup %4505 }
 0x19e   :  { %3774 = vmatprep.mubr.msk.f32.mxu1 %vm475_vm0, %v5142_v22 }
 0x1a1   :  { %v5152_v26 = vpop.eup %4507 }
 0x1a2   :  { %3775 = vmatmul.mubr.msk.f32.vlgmr.msra.gmra.mrb[4].mxu1 %vm475_vm0, %v5152_v26 }
 0x1a3   :  { %3930 = vmatpush3.bf16.msra.mxu1 %v3927_v47  ;;  %3793 = vmatprep.mubr.msk.f32.mxu1 %vm475_vm0, %v5142_v22  ;;  %v5215_v47 = vpack.c.bf16 %v696_v46, %v694_v45 }
 0x1a4   :  { %3932 = vmatprep.subr.bf16.mxu1 %v3931_v25 }
 0x1a5   :  { %3952 = vmatprep.subr.bf16.mxu0 %v5215_v47 }
 0x1a6   :  { %3954 = vmatpush1.bf16.msra.mxu0 %v5223_v50 }
 0x1a7   :  { %3934 = vmatpush3.bf16.msra.mxu1 %v3931_v25  ;;  %3956 = vmatprep.subr.bf16.mxu0 %v5233_v53 }
 0x1a8   :  { %3936 = vmatprep.subr.bf16.mxu1 %v3935_v29 }
 0x1aa   :  { %3958 = vmatpush1.bf16.msra.mxu0 %v5241_v56 }
 0x1ab   :  { %3938 = vmatpush3.bf16.msra.mxu1 %v3935_v29  ;;  %3960 = vmatprep.subr.bf16.mxu0 %v5251_v59 }
 0x1ac   :  { %3940 = vmatprep.subr.bf16.mxu1 %v3939_v32 }
 0x1ad   :  { %803 = vmatmul.mubr.f32.vlgmr.msra.gmra.mrb[8].mxu0 %v4709_v3 }
 0x1ae   :  { %3962 = vmatpush1.bf16.msra.mxu0 %v5259_v62  ;;  %876 = vmatprep.mubr.f32.mxu0 %v4709_v3 }
 0x1af   :  { %3942 = vmatpush3.bf16.msra.mxu1 %v3939_v32  ;;  %3964 = vmatprep.subr.bf16.mxu0 %v5271_v1 }
 0x1b2   :  { %3794 = vmatmul.mubr.msk.f32.vlgmr.msra.gmra.mrb[6].mxu1 %vm475_vm0, %v5152_v26  ;;  %3966 = vmatpush1.bf16.msra.mxu0 %v5279_v5 }
 0x1b3   :  { %982 = vmatprep.mubr.f32.mxu1 %v4709_v3  ;;  %3968 = vmatprep.subr.bf16.mxu0 %v5289_v8 }
 0x1b6   :  { %3970 = vmatpush1.bf16.msra.mxu0 %v5297_v11 }
 0x1b7   :  { %3972 = vmatprep.subr.bf16.mxu0 %v5307_v14 }
 0x1ba   :  { %3974 = vmatpush1.bf16.msra.mxu0 %v5315_v17 }
 0x1bb   :  { %4008 = vmatprep.subr.bf16.mxu0 %v5179_v35 }
 0x275   :  { %v3776_v19 = vpop.f32.mrb[4].mxu1 }
 0x276   :  { %v554_v20 = vadd.f32 %v3776_v19, %v3655_v18  ;;  %v548_v21 = vpop.f32.mrb[5].mxu1  ;;  %v5376_v19 = vpack.c.bf16 %v721_v16, %v719_v15  ;;  %v710_v16 = vld [vmem:[%s6007_s10 + $0x40] sm:$0xff] }
 0x277   :  { %v549_v23 = vadd.f32 %v3655_v18, %v548_v21  ;;  %v718_v18 = vld [vmem:[%s6006_s11] sm:$0xff]  ;;  %v723_v21 = vld [vmem:[%s6006_s11 + $0x28] sm:$0xff] }
 0x278   :  { %v3659_v24 = vmul.f32 -1.442695, %v554_v20  ;;  %v720_v20 = vld [vmem:[%s6006_s11 + $0x10] sm:$0xff]  ;;  %3976 = vmatprep.subr.bf16.mxu1 %v5376_v19 }
 0x279   :  { %v3658_v25 = vmul.f32 -1.442695, %v549_v23  ;;  %v725_v23 = vld [vmem:[%s6006_s11 + $0x38] sm:$0xff] }
 0x27a   :  { %4509 = vpow2.f32 %v3659_v24  ;;  %v5387_v24 = vpack.c.bf16 %v720_v20, %v718_v18  ;;  %v712_v18 = vld [vmem:[%s6007_s10 + $0x50] sm:$0xff]  ;;  %v715_v20 = vld [vmem:[%s6007_s10 + $0x68] sm:$0xff] }
 0x27b   :  { %4511 = vpow2.f32 %v3658_v25  ;;  %v5389_v25 = vpack.c.bf16 %v725_v23, %v723_v21  ;;  %v717_v21 = vld [vmem:[%s6007_s10 + $0x78] sm:$0xff]  ;;  %v5497_v23 = vpack.c.bf16 %v712_v18, %v710_v16 }
 0x27c   :  { %3978 = vmatpush1.bf16.msra.mxu1 %v5387_v24 }
 0x27d   :  { %3980 = vmatprep.subr.bf16.mxu1 %v5389_v25 }
 0x284   :  { %v4510_v28 = vpop.eup %4509 }
 0x285   :  { %v4512_v29 = vpop.eup %4511  ;;  %v564_v30 = vadd.f32 1.0, %v4510_v28  ;;  %v3795_v31 = vpop.f32.mrb[6].mxu1  ;;  %v724_v28 = vld [vmem:[%s6006_s11 + $0x30] sm:$0xff] }
 0x286   :  { %v563_v32 = vadd.f32 1.0, %v4512_v29  ;;  %v656_v33 = vadd.f32 %v3795_v31, %v3660_v27  ;;  %v650_v34 = vpop.f32.mrb[7].mxu1  ;;  %v727_v29 = vld [vmem:[%s6006_s11 + $0x48] sm:$0xff] }
 0x287   :  { %4513 = vrcp.f32 %v564_v30  ;;  %v651_v36 = vadd.f32 %v3660_v27, %v650_v34  ;;  %v722_v27 = vld [vmem:[%s6006_s11 + $0x20] sm:$0xff]  ;;  %v729_v30 = vld [vmem:[%s6006_s11 + $0x58] sm:$0xff]  ;;  %v728_v34 = vld [vmem:[%s6006_s11 + $0x50] sm:$0xff] }
 0x288   :  { %4515 = vrcp.f32 %v563_v32  ;;  %v660_v37 = vmax.f32 %v656_v33, 0.0  ;;  %v5405_v31 = vpack.c.bf16 %v724_v28, %v722_v27  ;;  %v5408_v32 = vpack.c.bf16 %v729_v30, %v727_v29  ;;  %v726_v33 = vld [vmem:[%s6006_s11 + $0x40] sm:$0xff]  ;;  %v716_v29 = vld [vmem:[%s6007_s10 + $0x70] sm:$0xff] }
 0x289   :  { %v659_v40 = vmax.f32 %v651_v36, 0.0  ;;  %v731_v36 = vld [vmem:[%s6006_s11 + $0x68] sm:$0xff]  ;;  %v5500_v27 = vpack.c.bf16 %v717_v21, %v715_v20  ;;  %v714_v28 = vld [vmem:[%s6007_s10 + $0x60] sm:$0xff] }
 0x28a   :  { %3982 = vmatpush1.bf16.msra.mxu1 %v5405_v31  ;;  %v5509_v30 = vpack.c.bf16 %v716_v29, %v714_v28 }
 0x28b   :  { %3984 = vmatprep.subr.bf16.mxu1 %v5408_v32 }
 0x291   :  { %v4514_v39 = vpop.eup %4513 }
 0x292   :  { %v4516_v42 = vpop.eup %4515  ;;  %v662_v43 = vmul.f32 %v4514_v39, %v660_v37  ;;  %v664_v45 = vsub.f32 1.0, %v4514_v39  ;;  %v733_v37 = vld [vmem:[%s6006_s11 + $0x78] sm:$0xff]  ;;  %v5423_v39 = vpack.c.bf16 %v728_v34, %v726_v33 }
 0x293   :  { %v661_v46 = vmul.f32 %v4516_v42, %v659_v40  ;;  %v663_v48 = vsub.f32 1.0, %v4516_v42  ;;  %v5426_v40 = vpack.c.bf16 %v733_v37, %v731_v36  ;;  %v730_v42 = vld [vmem:[%s6006_s11 + $0x60] sm:$0xff] }
 0x294   :  { %v666_v49 = vmul.f32 %v5152_v26, %v664_v45  ;;  %v703_v45 = vld [vmem:[%s6007_s10 + $0x8] sm:$0xff]  ;;  %3986 = vmatpush1.bf16.msra.mxu1 %v5423_v39 }
 0x295   :  { %v665_v51 = vmul.f32 %v5142_v22, %v663_v48  ;;  %v884_v22 = vlaneseq  ;;  %3988 = vmatprep.subr.bf16.mxu1 %v5426_v40 }
 0x296   :  { %v5328_v52 = vadd.f32 %v666_v49, %v662_v43  ;;  %v732_v43 = vld [vmem:[%s6006_s11 + $0x70] sm:$0xff] }
 0x297   :  { %v5330_v54 = vadd.f32 %v665_v51, %v661_v46  ;;  %v5343_v26 = vshrl.u32 %v884_v22, 7  ;;  %v705_v46 = vld [vmem:[%s6007_s10 + $0x18] sm:$0xff]  ;;  %v5441_v48 = vpack.c.bf16 %v732_v43, %v730_v42  ;;  %v702_v51 = vld [vmem:[%s6007_s10] sm:$0xff]  ;;  %v704_v22 = vld [vmem:[%s6007_s10 + $0x10] sm:$0xff] }
 0x298   :  { %v5444_v49 = vpack.c.bf16 %v705_v46, %v703_v45 }
 0x299   :  { %3663 = vmatmul.mubr.msk.f32.vlgmr.msra.gmra.mrb[8].mxu0 %vm475_vm0, %v5330_v54  ;;  %v886_v55 = vsub.s32 0, %v5343_v26  ;;  %v890_v2 = vsub.s32 1, %v5343_v26  ;;  %3990 = vmatpush1.bf16.msra.mxu1 %v5441_v48 }
 0x29a   :  { %4010 = vmatpush1.bf16.msra.mxu0 %v5187_v38  ;;  %1164 = vmatprep.mubr.f32.mxu0 %v4709_v3 }
 0x29b   :  { %4012 = vmatprep.subr.bf16.mxu0 %v5197_v41  ;;  %v5351_v58 = vrot.slane %v701_v57, %v886_v55  ;;  %v5357_v4 = vrot.slane %v701_v57, %v890_v2  ;;  %v707_v57 = vld [vmem:[%s6007_s10 + $0x28] sm:$0xff]  ;;  %3992 = vmatprep.subr.bf16.mxu1 %v5444_v49 }
 0x29c   :  { %983 = vmatmul.mubr.f32.vlgmr.msra.gmra.mrb[8].mxu1 %v4709_v3 }
 0x29d   :  { %1058 = vmatprep.mubr.f32.mxu1 %v4709_v3 }
 0x29e   :  { %4014 = vmatpush1.bf16.msra.mxu0 %v5205_v44 }
 0x29f   :  { %4016 = vmatprep.subr.bf16.mxu0 %v5215_v47 }
 0x2a2   :  { %4018 = vmatpush1.bf16.msra.mxu0 %v5223_v50 }
 0x2a3   :  { %4020 = vmatprep.subr.bf16.mxu0 %v5233_v53 }
 0x2a6   :  { %4022 = vmatpush1.bf16.msra.mxu0 %v5241_v56 }
 0x2a7   :  { %4024 = vmatprep.subr.bf16.mxu0 %v5251_v59 }
 0x36c   :  { %v878_v60 = vpop.f32.mrb[8].mxu0 }
 0x36d   :  { %v894_v61 = vadd.f32 %v5351_v58, %v878_v60  ;;  %v880_v63 = vpop.f32.mrb[9].mxu0  ;;  %v709_v60 = vld [vmem:[%s6007_s10 + $0x38] sm:$0xff] }
 0x36e   :  { %v5360_v6 = vadd.f32 %v5357_v4, %v880_v63  ;;  %v5462_v63 = vpack.c.bf16 %v709_v60, %v707_v57 }
 0x36f   :  { %v3664_v0 = vmul.f32 -1.442695, %v894_v61  ;;  %v5459_v61 = vpack.c.bf16 %v704_v22, %v702_v51 }
 0x370   :  { %v3665_v33 = vmul.f32 -1.442695, %v5360_v6 }
 0x371   :  { %4517 = vpow2.f32 %v3664_v0  ;;  %v706_v0 = vld [vmem:[%s6007_s10 + $0x20] sm:$0xff]  ;;  %3994 = vmatpush1.bf16.msra.mxu1 %v5459_v61 }
 0x372   :  { %4519 = vtanh.f32 %v5360_v6  ;;  %3996 = vmatprep.subr.bf16.mxu1 %v5462_v63  ;;  %v1171_v6 = vrot.slane %v5330_v54, 2 }
 0x37b   :  { %v4518_v7 = vpop.eup %4517 }
 0x37c   :  { %v899_v9 = vadd.f32 1.0, %v4518_v7  ;;  %v4520_v10 = vpop.eup %4519  ;;  %v708_v7 = vld [vmem:[%s6007_s10 + $0x30] sm:$0xff] }
 0x37e   :  { %4521 = vrcp.f32 %v899_v9  ;;  %v711_v9 = vld [vmem:[%s6007_s10 + $0x48] sm:$0xff] }
 0x37f   :  { %4523 = vpow2.f32 %v3665_v33 }
 0x388   :  { %v5363_v12 = vpop.eup %4521 }
 0x389   :  { %v910_v13 = vmul.f32 %v5363_v12, %v4520_v10  ;;  %v713_v10 = vld [vmem:[%s6007_s10 + $0x58] sm:$0xff]  ;;  %v4524_v34 = vpop.eup %4523  ;;  %v909_v37 = vmul.f32 0.0, %v5363_v12  ;;  %v734_v12 = vld [vmem:[%s6008_s12] sm:$0x3] }
 0x38a   :  { %v5482_v15 = vpack.c.bf16 %v713_v10, %v711_v9  ;;  %v906_v36 = vadd.f32 1.0, %v4524_v34  ;;  %v5556_v57 = vrot.slane %v734_v12, %v886_v55  ;;  %v5561_v10 = vrot.slane %v734_v12, %v890_v2 }
 0x38b   :  { %912 = vrot.lane.b32.xlu0 %v910_v13, %s4710_s16  ;;  %v5478_v13 = vpack.c.bf16 %v708_v7, %v706_v0 }
 0x38c   :  { %4525 = vrcp.f32 %v906_v36 }
 0x38d   :  { %3998 = vmatpush1.bf16.msra.mxu1 %v5478_v13 }
 0x38e   :  { %4000 = vmatprep.subr.bf16.mxu1 %v5482_v15 }
 0x391   :  { %4002 = vmatpush1.bf16.msra.mxu1 %v5497_v23 }
 0x392   :  { %4004 = vmatprep.subr.bf16.mxu1 %v5500_v27 }
 0x395   :  { %4006 = vmatpush1.bf16.msra.mxu1 %v5509_v30 }
 0x396   :  { %4040 = vmatprep.subr.bf16.mxu1 %v5376_v19  ;;  %v4526_v45 = vpop.eup %4525 }
 0x3fd   :  { %v913_v42 = vpop.permute.xlu0 %912 }
 0x3fe   :  { %v5516_v43 = vadd.f32 %v913_v42, %v909_v37 }
 0x400   :  { %4527 = vtanh.f32 %v5516_v43 }
 0x40a   :  { %v4528_v46 = vpop.eup %4527 }
 0x40b   :  { %v917_v51 = vmul.f32 %v4528_v46, %v4526_v45 }
 0x40d   :  { %990 = vrot.lane.b32.xlu1 %v917_v51, %s4710_s16 }
 0x47f   :  { %v991_v22 = vpop.permute.xlu1 %990 }
 0x480   :  { %3666 = vmatmul.mubr.msk.f32.vlgmr.msra.gmra.mrb[8].mxu1 %vm475_vm0, %v991_v22  ;;  %3669 = vmatmul.mubr.msk.f32.vlgmr.msra.gmra.mrb[10].mxu0 %vm475_vm0, %v991_v22 }
 0x481   :  { %4026 = vmatpush1.bf16.msra.mxu0 %v5259_v62  ;;  %1238 = vmatprep.mubr.f32.mxu0 %v4709_v3 }
 0x482   :  { %4028 = vmatprep.subr.bf16.mxu0 %v5271_v1  ;;  %4042 = vmatpush1.bf16.msra.mxu1 %v5387_v24 }
 0x483   :  { %4044 = vmatprep.subr.bf16.mxu1 %v5389_v25  ;;  %1338 = vmatprep.mubr.f32.mxu1 %v4709_v3 }
 0x485   :  { %4030 = vmatpush1.bf16.msra.mxu0 %v5279_v5 }
 0x486   :  { %4032 = vmatprep.subr.bf16.mxu0 %v5289_v8  ;;  %4046 = vmatpush1.bf16.msra.mxu1 %v5405_v31 }
 0x487   :  { %4048 = vmatprep.subr.bf16.mxu1 %v5408_v32 }
 0x489   :  { %4034 = vmatpush1.bf16.msra.mxu0 %v5297_v11 }
 0x48a   :  { %4036 = vmatprep.subr.bf16.mxu0 %v5307_v14  ;;  %4050 = vmatpush1.bf16.msra.mxu1 %v5423_v39 }
 0x48b   :  { %4052 = vmatprep.subr.bf16.mxu1 %v5426_v40 }
 0x48d   :  { %4038 = vmatpush1.bf16.msra.mxu0 %v5315_v17 }
 0x48e   :  { %4054 = vmatpush1.bf16.msra.mxu1 %v5441_v48  ;;  %4072 = vmatprep.subr.bf16.mxu0 %v5179_v35 }
 0x48f   :  { %4056 = vmatprep.subr.bf16.mxu1 %v5444_v49 }
 0x490   :  { %3670 = vmatmul.mubr.msk.f32.vlgmr.msra.gmra.mrb[10].mxu0 %vm475_vm0, %v1171_v6 }
 0x491   :  { %4074 = vmatpush1.bf16.msra.mxu0 %v5187_v38  ;;  %1509 = vmatprep.mubr.f32.mxu0 %v4709_v3 }
 0x492   :  { %4076 = vmatprep.subr.bf16.mxu0 %v5197_v41 }
 0x495   :  { %4078 = vmatpush1.bf16.msra.mxu0 %v5205_v44 }
 0x496   :  { %4080 = vmatprep.subr.bf16.mxu0 %v5215_v47 }
 0x499   :  { %4082 = vmatpush1.bf16.msra.mxu0 %v5223_v50 }
 0x49a   :  { %4084 = vmatprep.subr.bf16.mxu0 %v5233_v53 }
 0x49d   :  { %4086 = vmatpush1.bf16.msra.mxu0 %v5241_v56 }
 0x49e   :  { %4088 = vmatprep.subr.bf16.mxu0 %v5251_v59 }
 0x553   :  { %v1060_v60 = vpop.f32.mrb[8].mxu1 }
 0x554   :  { %v1076_v0 = vadd.f32 %v5556_v57, %v1060_v60  ;;  %v1062_v7 = vpop.f32.mrb[9].mxu1 }
 0x555   :  { %v1077_v16 = vadd.f32 %v5561_v10, %v1062_v7 }
 0x556   :  { %v3667_v9 = vmul.f32 -1.442695, %v1076_v0 }
 0x557   :  { %v3668_v51 = vmul.f32 -1.442695, %v1077_v16 }
 0x558   :  { %4529 = vpow2.f32 %v3667_v9 }
 0x559   :  { %4531 = vtanh.f32 %v1077_v16 }
 0x562   :  { %v4530_v18 = vpop.eup %4529 }
 0x563   :  { %v1081_v20 = vadd.f32 1.0, %v4530_v18  ;;  %v1240_v21 = vpop.f32.mrb[10].mxu0  ;;  %v4532_v33 = vpop.eup %4531 }
 0x564   :  { %v1245_v28 = vadd.f32 %v1240_v21, %v5351_v58  ;;  %v1242_v55 = vpop.f32.mrb[11].mxu0 }
 0x565   :  { %4533 = vrcp.f32 %v1081_v20  ;;  %v1246_v36 = vadd.f32 %v1242_v55, %v5357_v4 }
 0x566   :  { %v3671_v29 = vmul.f32 -1.442695, %v1245_v28 }
 0x567   :  { %v3672_v6 = vmul.f32 -1.442695, %v1246_v36 }
 0x568   :  { %4535 = vpow2.f32 %v3671_v29 }
 0x569   :  { %4537 = vtanh.f32 %v1246_v36 }
 0x56f   :  { %v4534_v34 = vpop.eup %4533 }
 0x570   :  { %v1092_v37 = vmul.f32 %v4534_v34, %v4532_v33  ;;  %v1091_v60 = vmul.f32 0.0, %v4534_v34 }
 0x572   :  { %v4536_v26 = vpop.eup %4535  ;;  %1094 = vrot.lane.b32.xlu0 %v1092_v37, %s4710_s16 }
 0x573   :  { %v1250_v2 = vadd.f32 1.0, %v4536_v26  ;;  %v4538_v42 = vpop.eup %4537  ;;  %v1516_v26 = vrot.slane %v5330_v54, 4 }
 0x575   :  { %4539 = vrcp.f32 %v1250_v2 }
 0x576   :  { %4541 = vpow2.f32 %v3668_v51 }
 0x577   :  { %4543 = vpow2.f32 %v3672_v6 }
 0x57f   :  { %v4540_v45 = vpop.eup %4539 }
 0x580   :  { %v1261_v46 = vmul.f32 %v4540_v45, %v4538_v42  ;;  %v4542_v22 = vpop.eup %4541  ;;  %v1260_v55 = vmul.f32 %v4540_v45, %v5516_v43 }
 0x581   :  { %v1088_v12 = vadd.f32 1.0, %v4542_v22  ;;  %v4544_v9 = vpop.eup %4543 }
 0x582   :  { %1263 = vrot.lane.b32.xlu1 %v1261_v46, %s4710_s16  ;;  %v1257_v21 = vadd.f32 1.0, %v4544_v9 }
 0x583   :  { %4545 = vrcp.f32 %v1088_v12 }
 0x58d   :  { %v4546_v18 = vpop.eup %4545 }
 0x5e4   :  { %v1095_v0 = vpop.permute.xlu0 %1094 }
 0x5e5   :  { %v5568_v7 = vadd.f32 %v1095_v0, %v1091_v60 }
 0x5e7   :  { %4547 = vtanh.f32 %v5568_v7 }
 0x5e8   :  { %4549 = vrcp.f32 %v1257_v21 }
 0x5f1   :  { %v4548_v20 = vpop.eup %4547 }
 0x5f2   :  { %v1099_v28 = vmul.f32 %v4548_v20, %v4546_v18  ;;  %v4550_v33 = vpop.eup %4549 }
 0x5f4   :  { %v1264_v16 = vpop.permute.xlu1 %1263  ;;  %1270 = vrot.lane.b32.xlu0 %v1099_v28, %s4710_s16 }
 0x5f5   :  { %v5573_v29 = vadd.f32 %v1264_v16, %v1260_v55 }
 0x5f7   :  { %4551 = vtanh.f32 %v5573_v29 }
 0x601   :  { %v4552_v34 = vpop.eup %4551 }
 0x602   :  { %v1268_v36 = vmul.f32 %v4552_v34, %v4550_v33 }
 0x604   :  { %1346 = vrot.lane.b32.xlu1 %v1268_v36, %s4710_s16 }
 0x666   :  { %v5577_v37 = vpop.permute.xlu0 %1270 }
 0x667   :  { %3673 = vmatmul.mubr.msk.f32.vlgmr.msra.gmra.mrb[10].mxu1 %vm475_vm0, %v5577_v37 }
 0x668   :  { %4058 = vmatpush1.bf16.msra.mxu1 %v5459_v61  ;;  %1414 = vmatprep.mubr.f32.mxu1 %v4709_v3 }
 0x669   :  { %4060 = vmatprep.subr.bf16.mxu1 %v5462_v63 }
 0x66c   :  { %4062 = vmatpush1.bf16.msra.mxu1 %v5478_v13 }
 0x66d   :  { %4064 = vmatprep.subr.bf16.mxu1 %v5482_v15 }
 0x670   :  { %4066 = vmatpush1.bf16.msra.mxu1 %v5497_v23 }
 0x671   :  { %4068 = vmatprep.subr.bf16.mxu1 %v5500_v27 }
 0x674   :  { %4070 = vmatpush1.bf16.msra.mxu1 %v5509_v30 }
 0x675   :  { %4104 = vmatprep.subr.bf16.mxu1 %v5376_v19 }
 0x676   :  { %v1347_v43 = vpop.permute.xlu1 %1346 }
 0x677   :  { %3674 = vmatmul.mubr.msk.f32.vlgmr.msra.gmra.mrb[10].mxu1 %vm475_vm0, %v1347_v43  ;;  %3677 = vmatmul.mubr.msk.f32.vlgmr.msra.gmra.mrb[12].mxu0 %vm475_vm0, %v1347_v43 }
 0x678   :  { %4090 = vmatpush1.bf16.msra.mxu0 %v5259_v62  ;;  %1583 = vmatprep.mubr.f32.mxu0 %v4709_v3 }
 0x679   :  { %4092 = vmatprep.subr.bf16.mxu0 %v5271_v1  ;;  %4106 = vmatpush1.bf16.msra.mxu1 %v5387_v24 }
 0x67a   :  { %4108 = vmatprep.subr.bf16.mxu1 %v5389_v25  ;;  %1683 = vmatprep.mubr.f32.mxu1 %v4709_v3 }
 0x67c   :  { %4094 = vmatpush1.bf16.msra.mxu0 %v5279_v5 }
 0x67d   :  { %4096 = vmatprep.subr.bf16.mxu0 %v5289_v8  ;;  %4110 = vmatpush1.bf16.msra.mxu1 %v5405_v31 }
 0x67e   :  { %4112 = vmatprep.subr.bf16.mxu1 %v5408_v32 }
 0x680   :  { %4098 = vmatpush1.bf16.msra.mxu0 %v5297_v11 }
 0x681   :  { %4100 = vmatprep.subr.bf16.mxu0 %v5307_v14  ;;  %4114 = vmatpush1.bf16.msra.mxu1 %v5423_v39 }
 0x682   :  { %4116 = vmatprep.subr.bf16.mxu1 %v5426_v40 }
 0x684   :  { %4102 = vmatpush1.bf16.msra.mxu0 %v5315_v17 }
 0x685   :  { %4118 = vmatpush1.bf16.msra.mxu1 %v5441_v48  ;;  %4136 = vmatprep.subr.bf16.mxu0 %v5179_v35 }
 0x686   :  { %4120 = vmatprep.subr.bf16.mxu1 %v5444_v49 }
 0x687   :  { %3678 = vmatmul.mubr.msk.f32.vlgmr.msra.gmra.mrb[12].mxu0 %vm475_vm0, %v1516_v26 }
 0x688   :  { %4138 = vmatpush1.bf16.msra.mxu0 %v5187_v38  ;;  %1854 = vmatprep.mubr.f32.mxu0 %v4709_v3 }
 0x689   :  { %4140 = vmatprep.subr.bf16.mxu0 %v5197_v41 }
 0x68c   :  { %4142 = vmatpush1.bf16.msra.mxu0 %v5205_v44 }
 0x68d   :  { %4144 = vmatprep.subr.bf16.mxu0 %v5215_v47 }
 0x690   :  { %4146 = vmatpush1.bf16.msra.mxu0 %v5223_v50 }
 0x691   :  { %4148 = vmatprep.subr.bf16.mxu0 %v5233_v53 }
 0x694   :  { %4150 = vmatpush1.bf16.msra.mxu0 %v5241_v56 }
 0x695   :  { %4152 = vmatprep.subr.bf16.mxu0 %v5251_v59 }
 0x74a   :  { %v1416_v2 = vpop.f32.mrb[10].mxu1 }
 0x74b   :  { %v1421_v42 = vadd.f32 %v1416_v2, %v5556_v57  ;;  %v1418_v45 = vpop.f32.mrb[11].mxu1 }
 0x74c   :  { %v1422_v51 = vadd.f32 %v1418_v45, %v5561_v10 }
 0x74d   :  { %v3675_v46 = vmul.f32 -1.442695, %v1421_v42 }
 0x74e   :  { %v3676_v43 = vmul.f32 -1.442695, %v1422_v51 }
 0x74f   :  { %4553 = vpow2.f32 %v3675_v46 }
 0x750   :  { %4555 = vtanh.f32 %v1422_v51 }
 0x759   :  { %v4554_v22 = vpop.eup %4553 }
 0x75a   :  { %v1426_v6 = vadd.f32 1.0, %v4554_v22  ;;  %v1585_v12 = vpop.f32.mrb[12].mxu0  ;;  %v4556_v18 = vpop.eup %4555 }
 0x75b   :  { %v1590_v60 = vadd.f32 %v1585_v12, %v5351_v58  ;;  %v1587_v0 = vpop.f32.mrb[13].mxu0 }
 0x75c   :  { %4557 = vrcp.f32 %v1426_v6  ;;  %v1591_v21 = vadd.f32 %v1587_v0, %v5357_v4 }
 0x75d   :  { %v3679_v9 = vmul.f32 -1.442695, %v1590_v60 }
 0x75e   :  { %v3680_v2 = vmul.f32 -1.442695, %v1591_v21 }
 0x75f   :  { %4559 = vpow2.f32 %v3679_v9 }
 0x760   :  { %4561 = vtanh.f32 %v1591_v21 }
 0x766   :  { %v4558_v20 = vpop.eup %4557 }
 0x767   :  { %v1437_v28 = vmul.f32 %v4558_v20, %v4556_v18  ;;  %v1436_v45 = vmul.f32 %v4558_v20, %v5568_v7 }
 0x769   :  { %v4560_v55 = vpop.eup %4559  ;;  %1439 = vrot.lane.b32.xlu0 %v1437_v28, %s4710_s16 }
 0x76a   :  { %v1595_v16 = vadd.f32 1.0, %v4560_v55  ;;  %v4562_v33 = vpop.eup %4561 }
 0x76c   :  { %4563 = vrcp.f32 %v1595_v16  ;;  %v1861_v16 = vrot.slane %v5330_v54, 6 }
 0x76d   :  { %4565 = vpow2.f32 %v3676_v43 }
 0x76e   :  { %4567 = vpow2.f32 %v3680_v2 }
 0x776   :  { %v4564_v34 = vpop.eup %4563 }
 0x777   :  { %v1606_v36 = vmul.f32 %v4564_v34, %v4562_v33  ;;  %v4566_v26 = vpop.eup %4565  ;;  %v1605_v51 = vmul.f32 %v4564_v34, %v5573_v29 }
 0x778   :  { %v1433_v42 = vadd.f32 1.0, %v4566_v26  ;;  %v4568_v6 = vpop.eup %4567 }
 0x779   :  { %1608 = vrot.lane.b32.xlu1 %v1606_v36, %s4710_s16  ;;  %v1602_v0 = vadd.f32 1.0, %v4568_v6 }
 0x77a   :  { %4569 = vrcp.f32 %v1433_v42 }
 0x784   :  { %v4570_v12 = vpop.eup %4569 }
 0x7db   :  { %v1440_v46 = vpop.permute.xlu0 %1439 }
 0x7dc   :  { %v5628_v22 = vadd.f32 %v1440_v46, %v1436_v45 }
 0x7de   :  { %4571 = vtanh.f32 %v5628_v22 }
 0x7df   :  { %4573 = vrcp.f32 %v1602_v0 }
 0x7e8   :  { %v4572_v60 = vpop.eup %4571 }
 0x7e9   :  { %v1444_v9 = vmul.f32 %v4572_v60, %v4570_v12  ;;  %v4574_v7 = vpop.eup %4573 }
 0x7eb   :  { %v1609_v18 = vpop.permute.xlu1 %1608  ;;  %1615 = vrot.lane.b32.xlu0 %v1444_v9, %s4710_s16 }
 0x7ec   :  { %v5633_v21 = vadd.f32 %v1609_v18, %v1605_v51 }
 0x7ee   :  { %4575 = vtanh.f32 %v5633_v21 }
 0x7f8   :  { %v4576_v20 = vpop.eup %4575 }
 0x7f9   :  { %v1613_v28 = vmul.f32 %v4576_v20, %v4574_v7 }
 0x7fb   :  { %1691 = vrot.lane.b32.xlu1 %v1613_v28, %s4710_s16 }
 0x85d   :  { %v5637_v55 = vpop.permute.xlu0 %1615 }
 0x85e   :  { %3681 = vmatmul.mubr.msk.f32.vlgmr.msra.gmra.mrb[12].mxu1 %vm475_vm0, %v5637_v55 }
 0x85f   :  { %4122 = vmatpush1.bf16.msra.mxu1 %v5459_v61  ;;  %1759 = vmatprep.mubr.f32.mxu1 %v4709_v3 }
 0x860   :  { %4124 = vmatprep.subr.bf16.mxu1 %v5462_v63 }
 0x863   :  { %4126 = vmatpush1.bf16.msra.mxu1 %v5478_v13 }
 0x864   :  { %4128 = vmatprep.subr.bf16.mxu1 %v5482_v15 }
 0x867   :  { %4130 = vmatpush1.bf16.msra.mxu1 %v5497_v23 }
 0x868   :  { %4132 = vmatprep.subr.bf16.mxu1 %v5500_v27 }
 0x86b   :  { %4134 = vmatpush1.bf16.msra.mxu1 %v5509_v30 }
 0x86c   :  { %4168 = vmatprep.subr.bf16.mxu1 %v5376_v19 }
 0x86d   :  { %v1692_v29 = vpop.permute.xlu1 %1691 }
 0x86e   :  { %3682 = vmatmul.mubr.msk.f32.vlgmr.msra.gmra.mrb[12].mxu1 %vm475_vm0, %v1692_v29  ;;  %3685 = vmatmul.mubr.msk.f32.vlgmr.msra.gmra.mrb[14].mxu0 %vm475_vm0, %v1692_v29 }
 0x86f   :  { %4154 = vmatpush1.bf16.msra.mxu0 %v5259_v62  ;;  %1928 = vmatprep.mubr.f32.mxu0 %v4709_v3 }
 0x870   :  { %4156 = vmatprep.subr.bf16.mxu0 %v5271_v1  ;;  %4170 = vmatpush1.bf16.msra.mxu1 %v5387_v24 }
 0x871   :  { %4172 = vmatprep.subr.bf16.mxu1 %v5389_v25  ;;  %2028 = vmatprep.mubr.f32.mxu1 %v4709_v3 }
 0x873   :  { %4158 = vmatpush1.bf16.msra.mxu0 %v5279_v5 }
 0x874   :  { %4160 = vmatprep.subr.bf16.mxu0 %v5289_v8  ;;  %4174 = vmatpush1.bf16.msra.mxu1 %v5405_v31 }
 0x875   :  { %4176 = vmatprep.subr.bf16.mxu1 %v5408_v32 }
 0x877   :  { %4162 = vmatpush1.bf16.msra.mxu0 %v5297_v11 }
 0x878   :  { %4164 = vmatprep.subr.bf16.mxu0 %v5307_v14  ;;  %4178 = vmatpush1.bf16.msra.mxu1 %v5423_v39 }
 0x879   :  { %4180 = vmatprep.subr.bf16.mxu1 %v5426_v40 }
 0x87b   :  { %4166 = vmatpush1.bf16.msra.mxu0 %v5315_v17 }
 0x87c   :  { %4182 = vmatpush1.bf16.msra.mxu1 %v5441_v48  ;;  %4200 = vmatprep.subr.bf16.mxu0 %v5179_v35 }
 0x87d   :  { %4184 = vmatprep.subr.bf16.mxu1 %v5444_v49 }
 0x87e   :  { %3686 = vmatmul.mubr.msk.f32.vlgmr.msra.gmra.mrb[14].mxu0 %vm475_vm0, %v1861_v16 }
 0x87f   :  { %4202 = vmatpush1.bf16.msra.mxu0 %v5187_v38  ;;  %2199 = vmatprep.mubr.f32.mxu0 %v4709_v3 }
 0x880   :  { %4204 = vmatprep.subr.bf16.mxu0 %v5197_v41 }
 0x883   :  { %4206 = vmatpush1.bf16.msra.mxu0 %v5205_v44 }
 0x884   :  { %4208 = vmatprep.subr.bf16.mxu0 %v5215_v47 }
 0x887   :  { %4210 = vmatpush1.bf16.msra.mxu0 %v5223_v50 }
 0x888   :  { %4212 = vmatprep.subr.bf16.mxu0 %v5233_v53 }
 0x88b   :  { %4214 = vmatpush1.bf16.msra.mxu0 %v5241_v56 }
 0x88c   :  { %4216 = vmatprep.subr.bf16.mxu0 %v5251_v59 }
 0x941   :  { %v1761_v54 = vpop.f32.mrb[12].mxu1 }
 0x942   :  { %v1766_v33 = vadd.f32 %v1761_v54, %v5556_v57  ;;  %v1763_v34 = vpop.f32.mrb[13].mxu1 }
 0x943   :  { %v1767_v43 = vadd.f32 %v1763_v34, %v5561_v10 }
 0x944   :  { %v3683_v36 = vmul.f32 -1.442695, %v1766_v33 }
 0x945   :  { %v3684_v29 = vmul.f32 -1.442695, %v1767_v43 }
 0x946   :  { %4577 = vpow2.f32 %v3683_v36 }
 0x947   :  { %4579 = vtanh.f32 %v1767_v43 }
 0x950   :  { %v4578_v26 = vpop.eup %4577 }
 0x951   :  { %v1771_v2 = vadd.f32 1.0, %v4578_v26  ;;  %v1930_v42 = vpop.f32.mrb[14].mxu0  ;;  %v4580_v12 = vpop.eup %4579 }
 0x952   :  { %v1935_v45 = vadd.f32 %v1930_v42, %v5351_v58  ;;  %v1932_v46 = vpop.f32.mrb[15].mxu0 }
 0x953   :  { %4581 = vrcp.f32 %v1771_v2  ;;  %v1936_v0 = vadd.f32 %v1932_v46, %v5357_v4 }
 0x954   :  { %v3687_v6 = vmul.f32 -1.442695, %v1935_v45 }
 0x955   :  { %v3688_v54 = vmul.f32 -1.442695, %v1936_v0 }
 0x956   :  { %4583 = vpow2.f32 %v3687_v6 }
 0x957   :  { %4585 = vtanh.f32 %v1936_v0 }
 0x95d   :  { %v4582_v60 = vpop.eup %4581 }
 0x95e   :  { %v1782_v9 = vmul.f32 %v4582_v60, %v4580_v12  ;;  %v1781_v34 = vmul.f32 %v4582_v60, %v5628_v22 }
 0x960   :  { %v4584_v51 = vpop.eup %4583  ;;  %1784 = vrot.lane.b32.xlu0 %v1782_v9, %s4710_s16 }
 0x961   :  { %v1940_v18 = vadd.f32 1.0, %v4584_v51  ;;  %v4586_v7 = vpop.eup %4585 }
 0x963   :  { %4587 = vrcp.f32 %v1940_v18 }
 0x964   :  { %4589 = vpow2.f32 %v3684_v29 }
 0x965   :  { %4591 = vpow2.f32 %v3688_v54 }
 0x96d   :  { %v4588_v20 = vpop.eup %4587 }
 0x96e   :  { %v1951_v28 = vmul.f32 %v4588_v20, %v4586_v7  ;;  %v4590_v16 = vpop.eup %4589  ;;  %v1950_v43 = vmul.f32 %v4588_v20, %v5633_v21 }
 0x96f   :  { %v1778_v33 = vadd.f32 1.0, %v4590_v16  ;;  %v4592_v2 = vpop.eup %4591 }
 0x970   :  { %1953 = vrot.lane.b32.xlu1 %v1951_v28, %s4710_s16  ;;  %v1947_v46 = vadd.f32 1.0, %v4592_v2 }
 0x971   :  { %4593 = vrcp.f32 %v1778_v33 }
 0x97b   :  { %v4594_v42 = vpop.eup %4593 }
 0x9d2   :  { %v1785_v36 = vpop.permute.xlu0 %1784 }
 0x9d3   :  { %v5688_v26 = vadd.f32 %v1785_v36, %v1781_v34 }
 0x9d5   :  { %4595 = vtanh.f32 %v5688_v26 }
 0x9d6   :  { %4597 = vrcp.f32 %v1947_v46 }
 0x9df   :  { %v4596_v45 = vpop.eup %4595 }
 0x9e0   :  { %v1789_v6 = vmul.f32 %v4596_v45, %v4594_v42  ;;  %v4598_v22 = vpop.eup %4597 }
 0x9e2   :  { %v1954_v12 = vpop.permute.xlu1 %1953  ;;  %1960 = vrot.lane.b32.xlu0 %v1789_v6, %s4710_s16 }
 0x9e3   :  { %v5693_v0 = vadd.f32 %v1954_v12, %v1950_v43 }
 0x9e5   :  { %4599 = vtanh.f32 %v5693_v0 }
 0x9ef   :  { %v4600_v60 = vpop.eup %4599 }
 0x9f0   :  { %v1958_v9 = vmul.f32 %v4600_v60, %v4598_v22 }
 0x9f2   :  { %2036 = vrot.lane.b32.xlu1 %v1958_v9, %s4710_s16 }
 0xa54   :  { %v5697_v51 = vpop.permute.xlu0 %1960 }
 0xa55   :  { %3689 = vmatmul.mubr.msk.f32.vlgmr.msra.gmra.mrb[14].mxu1 %vm475_vm0, %v5697_v51 }
 0xa56   :  { %4186 = vmatpush1.bf16.msra.mxu1 %v5459_v61  ;;  %2104 = vmatprep.mubr.f32.mxu1 %v4709_v3 }
 0xa57   :  { %4188 = vmatprep.subr.bf16.mxu1 %v5462_v63 }
 0xa5a   :  { %4190 = vmatpush1.bf16.msra.mxu1 %v5478_v13 }
 0xa5b   :  { %4192 = vmatprep.subr.bf16.mxu1 %v5482_v15 }
 0xa5e   :  { %4194 = vmatpush1.bf16.msra.mxu1 %v5497_v23 }
 0xa5f   :  { %4196 = vmatprep.subr.bf16.mxu1 %v5500_v27 }
 0xa62   :  { %4198 = vmatpush1.bf16.msra.mxu1 %v5509_v30 }
 0xa63   :  { %4232 = vmatprep.subr.bf16.mxu1 %v5376_v19 }
 0xa64   :  { %v2037_v21 = vpop.permute.xlu1 %2036 }
 0xa65   :  { %3690 = vmatmul.mubr.msk.f32.vlgmr.msra.gmra.mrb[14].mxu1 %vm475_vm0, %v2037_v21  ;;  %3693 = vmatmul.mubr.msk.f32.vlgmr.msra.gmra.mrb[16].mxu0 %vm475_vm0, %v2037_v21 }
 0xa66   :  { %4218 = vmatpush1.bf16.msra.mxu0 %v5259_v62  ;;  %2273 = vmatprep.mubr.f32.mxu0 %v4709_v3 }
 0xa67   :  { %4220 = vmatprep.subr.bf16.mxu0 %v5271_v1  ;;  %4234 = vmatpush1.bf16.msra.mxu1 %v5387_v24 }
 0xa68   :  { %4236 = vmatprep.subr.bf16.mxu1 %v5389_v25  ;;  %2373 = vmatprep.mubr.f32.mxu1 %v4709_v3 }
 0xa6a   :  { %4222 = vmatpush1.bf16.msra.mxu0 %v5279_v5 }
 0xa6b   :  { %4224 = vmatprep.subr.bf16.mxu0 %v5289_v8  ;;  %4238 = vmatpush1.bf16.msra.mxu1 %v5405_v31 }
 0xa6c   :  { %4240 = vmatprep.subr.bf16.mxu1 %v5408_v32 }
 0xa6e   :  { %4226 = vmatpush1.bf16.msra.mxu0 %v5297_v11 }
 0xa6f   :  { %4228 = vmatprep.subr.bf16.mxu0 %v5307_v14  ;;  %4242 = vmatpush1.bf16.msra.mxu1 %v5423_v39 }
 0xa70   :  { %4244 = vmatprep.subr.bf16.mxu1 %v5426_v40 }
 0xa72   :  { %4230 = vmatpush1.bf16.msra.mxu0 %v5315_v17 }
 0xa73   :  { %4246 = vmatpush1.bf16.msra.mxu1 %v5441_v48  ;;  %4264 = vmatprep.subr.bf16.mxu0 %v5179_v35 }
 0xa74   :  { %4248 = vmatprep.subr.bf16.mxu1 %v5444_v49 }
 0xa75   :  { %3694 = vmatmul.mubr.msk.f32.vlgmr.msra.gmra.mrb[16].mxu0 %vm475_vm0, %v5328_v52 }
 0xa76   :  { %4266 = vmatpush1.bf16.msra.mxu0 %v5187_v38  ;;  %2544 = vmatprep.mubr.f32.mxu0 %v4709_v3 }
 0xa77   :  { %4268 = vmatprep.subr.bf16.mxu0 %v5197_v41 }
 0xa7a   :  { %4270 = vmatpush1.bf16.msra.mxu0 %v5205_v44 }
 0xa7b   :  { %4272 = vmatprep.subr.bf16.mxu0 %v5215_v47 }
 0xa7e   :  { %4274 = vmatpush1.bf16.msra.mxu0 %v5223_v50 }
 0xa7f   :  { %4276 = vmatprep.subr.bf16.mxu0 %v5233_v53 }
 0xa82   :  { %4278 = vmatpush1.bf16.msra.mxu0 %v5241_v56 }
 0xa83   :  { %4280 = vmatprep.subr.bf16.mxu0 %v5251_v59 }
 0xb38   :  { %v2106_v18 = vpop.f32.mrb[14].mxu1 }
 0xb39   :  { %v2111_v7 = vadd.f32 %v2106_v18, %v5556_v57  ;;  %v2108_v20 = vpop.f32.mrb[15].mxu1 }
 0xb3a   :  { %v2112_v29 = vadd.f32 %v2108_v20, %v5561_v10 }
 0xb3b   :  { %v3691_v28 = vmul.f32 -1.442695, %v2111_v7 }
 0xb3c   :  { %v3692_v21 = vmul.f32 -1.442695, %v2112_v29 }
 0xb3d   :  { %4601 = vpow2.f32 %v3691_v28 }
 0xb3e   :  { %4603 = vtanh.f32 %v2112_v29 }
 0xb47   :  { %v4602_v16 = vpop.eup %4601 }
 0xb48   :  { %v2116_v54 = vadd.f32 1.0, %v4602_v16  ;;  %v2275_v33 = vpop.f32.mrb[16].mxu0  ;;  %v4604_v42 = vpop.eup %4603 }
 0xb49   :  { %v2280_v34 = vadd.f32 %v2275_v33, %v5351_v58  ;;  %v2277_v36 = vpop.f32.mrb[17].mxu0 }
 0xb4a   :  { %4605 = vrcp.f32 %v2116_v54  ;;  %v2281_v46 = vadd.f32 %v2277_v36, %v5357_v4 }
 0xb4b   :  { %v3695_v2 = vmul.f32 -1.442695, %v2280_v34 }
 0xb4c   :  { %v3696_v7 = vmul.f32 -1.442695, %v2281_v46 }
 0xb4d   :  { %4607 = vpow2.f32 %v3695_v2 }
 0xb4e   :  { %4609 = vtanh.f32 %v2281_v46 }
 0xb54   :  { %v4606_v45 = vpop.eup %4605 }
 0xb55   :  { %v2127_v6 = vmul.f32 %v4606_v45, %v4604_v42  ;;  %v2126_v28 = vmul.f32 %v4606_v45, %v5688_v26 }
 0xb57   :  { %v4608_v43 = vpop.eup %4607  ;;  %2129 = vrot.lane.b32.xlu0 %v2127_v6, %s4710_s16 }
 0xb58   :  { %v2285_v12 = vadd.f32 1.0, %v4608_v43  ;;  %v4610_v22 = vpop.eup %4609 }
 0xb5a   :  { %4611 = vrcp.f32 %v2285_v12 }
 0xb5b   :  { %4613 = vpow2.f32 %v3692_v21 }
 0xb5c   :  { %4615 = vpow2.f32 %v3696_v7 }
 0xb64   :  { %v4612_v60 = vpop.eup %4611 }
 0xb65   :  { %v2296_v9 = vmul.f32 %v4612_v60, %v4610_v22  ;;  %v4614_v18 = vpop.eup %4613  ;;  %v2295_v29 = vmul.f32 %v4612_v60, %v5693_v0  ;;  %v2551_v22 = vrot.slane %v5328_v52, 2 }
 0xb66   :  { %v2123_v20 = vadd.f32 1.0, %v4614_v18  ;;  %v4616_v33 = vpop.eup %4615 }
 0xb67   :  { %2298 = vrot.lane.b32.xlu1 %v2296_v9, %s4710_s16  ;;  %v2292_v2 = vadd.f32 1.0, %v4616_v33 }
 0xb68   :  { %4617 = vrcp.f32 %v2123_v20 }
 0xb72   :  { %v4618_v34 = vpop.eup %4617 }
 0xbc9   :  { %v2130_v16 = vpop.permute.xlu0 %2129 }
 0xbca   :  { %v5748_v54 = vadd.f32 %v2130_v16, %v2126_v28 }
 0xbcc   :  { %4619 = vtanh.f32 %v5748_v54 }
 0xbcd   :  { %4621 = vrcp.f32 %v2292_v2 }
 0xbd6   :  { %v4620_v36 = vpop.eup %4619 }
 0xbd7   :  { %v2134_v42 = vmul.f32 %v4620_v36, %v4618_v34  ;;  %v4622_v26 = vpop.eup %4621 }
 0xbd9   :  { %v2299_v6 = vpop.permute.xlu1 %2298  ;;  %2305 = vrot.lane.b32.xlu0 %v2134_v42, %s4710_s16 }
 0xbda   :  { %v5753_v46 = vadd.f32 %v2299_v6, %v2295_v29 }
 0xbdc   :  { %4623 = vtanh.f32 %v5753_v46 }
 0xbe6   :  { %v4624_v45 = vpop.eup %4623 }
 0xbe7   :  { %v2303_v43 = vmul.f32 %v4624_v45, %v4622_v26 }
 0xbe9   :  { %2381 = vrot.lane.b32.xlu1 %v2303_v43, %s4710_s16 }
 0xc4b   :  { %v5757_v12 = vpop.permute.xlu0 %2305 }
 0xc4c   :  { %3697 = vmatmul.mubr.msk.f32.vlgmr.msra.gmra.mrb[16].mxu1 %vm475_vm0, %v5757_v12 }
 0xc4d   :  { %4250 = vmatpush1.bf16.msra.mxu1 %v5459_v61  ;;  %2449 = vmatprep.mubr.f32.mxu1 %v4709_v3 }
 0xc4e   :  { %4252 = vmatprep.subr.bf16.mxu1 %v5462_v63 }
 0xc51   :  { %4254 = vmatpush1.bf16.msra.mxu1 %v5478_v13 }
 0xc52   :  { %4256 = vmatprep.subr.bf16.mxu1 %v5482_v15 }
 0xc55   :  { %4258 = vmatpush1.bf16.msra.mxu1 %v5497_v23 }
 0xc56   :  { %4260 = vmatprep.subr.bf16.mxu1 %v5500_v27 }
 0xc59   :  { %4262 = vmatpush1.bf16.msra.mxu1 %v5509_v30 }
 0xc5a   :  { %4296 = vmatprep.subr.bf16.mxu1 %v5376_v19 }
 0xc5b   :  { %v2382_v0 = vpop.permute.xlu1 %2381 }
 0xc5c   :  { %3698 = vmatmul.mubr.msk.f32.vlgmr.msra.gmra.mrb[16].mxu1 %vm475_vm0, %v2382_v0  ;;  %3701 = vmatmul.mubr.msk.f32.vlgmr.msra.gmra.mrb[18].mxu0 %vm475_vm0, %v2382_v0 }
 0xc5d   :  { %4282 = vmatpush1.bf16.msra.mxu0 %v5259_v62  ;;  %2618 = vmatprep.mubr.f32.mxu0 %v4709_v3 }
 0xc5e   :  { %4284 = vmatprep.subr.bf16.mxu0 %v5271_v1  ;;  %4298 = vmatpush1.bf16.msra.mxu1 %v5387_v24 }
 0xc5f   :  { %4300 = vmatprep.subr.bf16.mxu1 %v5389_v25  ;;  %2718 = vmatprep.mubr.f32.mxu1 %v4709_v3 }
 0xc61   :  { %4286 = vmatpush1.bf16.msra.mxu0 %v5279_v5 }
 0xc62   :  { %4288 = vmatprep.subr.bf16.mxu0 %v5289_v8  ;;  %4302 = vmatpush1.bf16.msra.mxu1 %v5405_v31 }
 0xc63   :  { %4304 = vmatprep.subr.bf16.mxu1 %v5408_v32 }
 0xc65   :  { %4290 = vmatpush1.bf16.msra.mxu0 %v5297_v11 }
 0xc66   :  { %4292 = vmatprep.subr.bf16.mxu0 %v5307_v14  ;;  %4306 = vmatpush1.bf16.msra.mxu1 %v5423_v39 }
 0xc67   :  { %4308 = vmatprep.subr.bf16.mxu1 %v5426_v40 }
 0xc69   :  { %4294 = vmatpush1.bf16.msra.mxu0 %v5315_v17 }
 0xc6a   :  { %4310 = vmatpush1.bf16.msra.mxu1 %v5441_v48  ;;  %4328 = vmatprep.subr.bf16.mxu0 %v5179_v35 }
 0xc6b   :  { %4312 = vmatprep.subr.bf16.mxu1 %v5444_v49 }
 0xc6c   :  { %3702 = vmatmul.mubr.msk.f32.vlgmr.msra.gmra.mrb[18].mxu0 %vm475_vm0, %v2551_v22 }
 0xc6d   :  { %4330 = vmatpush1.bf16.msra.mxu0 %v5187_v38  ;;  %2889 = vmatprep.mubr.f32.mxu0 %v4709_v3 }
 0xc6e   :  { %4332 = vmatprep.subr.bf16.mxu0 %v5197_v41 }
 0xc71   :  { %4334 = vmatpush1.bf16.msra.mxu0 %v5205_v44 }
 0xc72   :  { %4336 = vmatprep.subr.bf16.mxu0 %v5215_v47 }
 0xc75   :  { %4338 = vmatpush1.bf16.msra.mxu0 %v5223_v50 }
 0xc76   :  { %4340 = vmatprep.subr.bf16.mxu0 %v5233_v53 }
 0xc79   :  { %4342 = vmatpush1.bf16.msra.mxu0 %v5241_v56 }
 0xc7a   :  { %4344 = vmatprep.subr.bf16.mxu0 %v5251_v59 }
 0xd2f   :  { %v2451_v60 = vpop.f32.mrb[16].mxu1 }
 0xd30   :  { %v2456_v9 = vadd.f32 %v2451_v60, %v5556_v57  ;;  %v2453_v21 = vpop.f32.mrb[17].mxu1 }
 0xd31   :  { %v2457_v7 = vadd.f32 %v2453_v21, %v5561_v10 }
 0xd32   :  { %v3699_v18 = vmul.f32 -1.442695, %v2456_v9 }
 0xd33   :  { %v3700_v60 = vmul.f32 -1.442695, %v2457_v7 }
 0xd34   :  { %4625 = vpow2.f32 %v3699_v18 }
 0xd35   :  { %4627 = vtanh.f32 %v2457_v7 }
 0xd3e   :  { %v4626_v20 = vpop.eup %4625 }
 0xd3f   :  { %v2461_v28 = vadd.f32 1.0, %v4626_v20  ;;  %v2620_v16 = vpop.f32.mrb[18].mxu0  ;;  %v4628_v2 = vpop.eup %4627 }
 0xd40   :  { %v2625_v33 = vadd.f32 %v2620_v16, %v5351_v58  ;;  %v2622_v34 = vpop.f32.mrb[19].mxu0 }
 0xd41   :  { %4629 = vrcp.f32 %v2461_v28  ;;  %v2626_v29 = vadd.f32 %v2622_v34, %v5357_v4 }
 0xd42   :  { %v3703_v36 = vmul.f32 -1.442695, %v2625_v33 }
 0xd43   :  { %v3704_v21 = vmul.f32 -1.442695, %v2626_v29 }
 0xd44   :  { %4631 = vpow2.f32 %v3703_v36 }
 0xd45   :  { %4633 = vtanh.f32 %v2626_v29 }
 0xd4b   :  { %v4630_v42 = vpop.eup %4629 }
 0xd4c   :  { %v2472_v6 = vmul.f32 %v4630_v42, %v4628_v2  ;;  %v2471_v20 = vmul.f32 %v4630_v42, %v5748_v54 }
 0xd4e   :  { %v4632_v26 = vpop.eup %4631  ;;  %2474 = vrot.lane.b32.xlu0 %v2472_v6, %s4710_s16 }
 0xd4f   :  { %v2630_v45 = vadd.f32 1.0, %v4632_v26  ;;  %v4634_v43 = vpop.eup %4633 }
 0xd51   :  { %4635 = vrcp.f32 %v2630_v45 }
 0xd52   :  { %4637 = vpow2.f32 %v3700_v60 }
 0xd53   :  { %4639 = vpow2.f32 %v3704_v21 }
 0xd5b   :  { %v4636_v0 = vpop.eup %4635 }
 0xd5c   :  { %v2641_v22 = vmul.f32 %v4636_v0, %v4634_v43  ;;  %v4638_v9 = vpop.eup %4637  ;;  %v2640_v7 = vmul.f32 %v4636_v0, %v5753_v46  ;;  %v2896_v0 = vrot.slane %v5328_v52, 4 }
 0xd5d   :  { %v2468_v18 = vadd.f32 1.0, %v4638_v9  ;;  %v4640_v33 = vpop.eup %4639 }
 0xd5e   :  { %2643 = vrot.lane.b32.xlu1 %v2641_v22, %s4710_s16  ;;  %v2637_v2 = vadd.f32 1.0, %v4640_v33 }
 0xd5f   :  { %4641 = vrcp.f32 %v2468_v18 }
 0xd69   :  { %v4642_v34 = vpop.eup %4641 }
 0xdc0   :  { %v2475_v28 = vpop.permute.xlu0 %2474 }
 0xdc1   :  { %v5808_v16 = vadd.f32 %v2475_v28, %v2471_v20 }
 0xdc3   :  { %4643 = vtanh.f32 %v5808_v16 }
 0xdc4   :  { %4645 = vrcp.f32 %v2637_v2 }
 0xdcd   :  { %v4644_v36 = vpop.eup %4643 }
 0xdce   :  { %v2479_v6 = vmul.f32 %v4644_v36, %v4642_v34  ;;  %v4646_v54 = vpop.eup %4645 }
 0xdd0   :  { %v2644_v26 = vpop.permute.xlu1 %2643  ;;  %2650 = vrot.lane.b32.xlu0 %v2479_v6, %s4710_s16 }
 0xdd1   :  { %v5813_v29 = vadd.f32 %v2644_v26, %v2640_v7 }
 0xdd3   :  { %4647 = vtanh.f32 %v5813_v29 }
 0xddd   :  { %v4648_v42 = vpop.eup %4647 }
 0xdde   :  { %v2648_v45 = vmul.f32 %v4648_v42, %v4646_v54 }
 0xde0   :  { %2726 = vrot.lane.b32.xlu1 %v2648_v45, %s4710_s16 }
 0xe42   :  { %v5817_v43 = vpop.permute.xlu0 %2650 }
 0xe43   :  { %3705 = vmatmul.mubr.msk.f32.vlgmr.msra.gmra.mrb[18].mxu1 %vm475_vm0, %v5817_v43 }
 0xe44   :  { %4314 = vmatpush1.bf16.msra.mxu1 %v5459_v61  ;;  %2794 = vmatprep.mubr.f32.mxu1 %v4709_v3 }
 0xe45   :  { %4316 = vmatprep.subr.bf16.mxu1 %v5462_v63 }
 0xe48   :  { %4318 = vmatpush1.bf16.msra.mxu1 %v5478_v13 }
 0xe49   :  { %4320 = vmatprep.subr.bf16.mxu1 %v5482_v15 }
 0xe4c   :  { %4322 = vmatpush1.bf16.msra.mxu1 %v5497_v23 }
 0xe4d   :  { %4324 = vmatprep.subr.bf16.mxu1 %v5500_v27 }
 0xe50   :  { %4326 = vmatpush1.bf16.msra.mxu1 %v5509_v30 }
 0xe51   :  { %4360 = vmatprep.subr.bf16.mxu1 %v5376_v19 }
 0xe52   :  { %v2727_v46 = vpop.permute.xlu1 %2726 }
 0xe53   :  { %3706 = vmatmul.mubr.msk.f32.vlgmr.msra.gmra.mrb[18].mxu1 %vm475_vm0, %v2727_v46  ;;  %3709 = vmatmul.mubr.msk.f32.vlgmr.msra.gmra.mrb[20].mxu0 %vm475_vm0, %v2727_v46 }
 0xe54   :  { %4346 = vmatpush1.bf16.msra.mxu0 %v5259_v62  ;;  %2963 = vmatprep.mubr.f32.mxu0 %v4709_v3 }
 0xe55   :  { %4348 = vmatprep.subr.bf16.mxu0 %v5271_v1  ;;  %4362 = vmatpush1.bf16.msra.mxu1 %v5387_v24 }
 0xe56   :  { %4364 = vmatprep.subr.bf16.mxu1 %v5389_v25  ;;  %3063 = vmatprep.mubr.f32.mxu1 %v4709_v3 }
 0xe58   :  { %4350 = vmatpush1.bf16.msra.mxu0 %v5279_v5 }
 0xe59   :  { %4352 = vmatprep.subr.bf16.mxu0 %v5289_v8  ;;  %4366 = vmatpush1.bf16.msra.mxu1 %v5405_v31 }
 0xe5a   :  { %4368 = vmatprep.subr.bf16.mxu1 %v5408_v32 }
 0xe5c   :  { %4354 = vmatpush1.bf16.msra.mxu0 %v5297_v11 }
 0xe5d   :  { %4356 = vmatprep.subr.bf16.mxu0 %v5307_v14  ;;  %4370 = vmatpush1.bf16.msra.mxu1 %v5423_v39 }
 0xe5e   :  { %4372 = vmatprep.subr.bf16.mxu1 %v5426_v40 }
 0xe60   :  { %4358 = vmatpush1.bf16.msra.mxu0 %v5315_v17 }
 0xe61   :  { %4374 = vmatpush1.bf16.msra.mxu1 %v5441_v48  ;;  %4392 = vmatprep.subr.bf16.mxu0 %v5179_v35 }
 0xe62   :  { %4376 = vmatprep.subr.bf16.mxu1 %v5444_v49 }
 0xe63   :  { %3710 = vmatmul.mubr.msk.f32.vlgmr.msra.gmra.mrb[20].mxu0 %vm475_vm0, %v2896_v0 }
 0xe64   :  { %4394 = vmatpush1.bf16.msra.mxu0 %v5187_v38  ;;  %3234 = vmatprep.mubr.f32.mxu0 %v4709_v3 }
 0xe65   :  { %4396 = vmatprep.subr.bf16.mxu0 %v5197_v41 }
 0xe68   :  { %4398 = vmatpush1.bf16.msra.mxu0 %v5205_v44 }
 0xe69   :  { %4400 = vmatprep.subr.bf16.mxu0 %v5215_v47 }
 0xe6c   :  { %4402 = vmatpush1.bf16.msra.mxu0 %v5223_v50 }
 0xe6d   :  { %4404 = vmatprep.subr.bf16.mxu0 %v5233_v53 }
 0xe70   :  { %4406 = vmatpush1.bf16.msra.mxu0 %v5241_v56 }
 0xe71   :  { %4408 = vmatprep.subr.bf16.mxu0 %v5251_v59 }
 0xf26   :  { %v2796_v35 = vpop.f32.mrb[18].mxu1 }
 0xf27   :  { %v2801_v22 = vadd.f32 %v2796_v35, %v5556_v57  ;;  %v2798_v38 = vpop.f32.mrb[19].mxu1 }
 0xf28   :  { %v2802_v41 = vadd.f32 %v2798_v38, %v5561_v10 }
 0xf29   :  { %v3707_v60 = vmul.f32 -1.442695, %v2801_v22 }
 0xf2a   :  { %v3708_v6 = vmul.f32 -1.442695, %v2802_v41 }
 0xf2b   :  { %4649 = vpow2.f32 %v3707_v60 }
 0xf2c   :  { %4651 = vtanh.f32 %v2802_v41 }
 0xf35   :  { %v4650_v9 = vpop.eup %4649 }
 0xf36   :  { %v2806_v44 = vadd.f32 1.0, %v4650_v9  ;;  %v2965_v21 = vpop.f32.mrb[20].mxu0  ;;  %v4652_v56 = vpop.eup %4651 }
 0xf37   :  { %v2970_v47 = vadd.f32 %v2965_v21, %v5351_v58  ;;  %v2967_v50 = vpop.f32.mrb[21].mxu0 }
 0xf38   :  { %4653 = vrcp.f32 %v2806_v44  ;;  %v2971_v18 = vadd.f32 %v2967_v50, %v5357_v4 }
 0xf39   :  { %v3711_v53 = vmul.f32 -1.442695, %v2970_v47 }
 0xf3a   :  { %v3712_v26 = vmul.f32 -1.442695, %v2971_v18 }
 0xf3b   :  { %4655 = vpow2.f32 %v3711_v53 }
 0xf3c   :  { %4657 = vtanh.f32 %v2971_v18 }
 0xf42   :  { %v4654_v59 = vpop.eup %4653 }
 0xf43   :  { %v2817_v20 = vmul.f32 %v4654_v59, %v4652_v56  ;;  %v2816_v42 = vmul.f32 %v4654_v59, %v5808_v16 }
 0xf45   :  { %v4656_v28 = vpop.eup %4655  ;;  %2819 = vrot.lane.b32.xlu0 %v2817_v20, %s4710_s16 }
 0xf46   :  { %v2975_v33 = vadd.f32 1.0, %v4656_v28  ;;  %v4658_v34 = vpop.eup %4657 }
 0xf48   :  { %4659 = vrcp.f32 %v2975_v33 }
 0xf49   :  { %4661 = vpow2.f32 %v3708_v6 }
 0xf4a   :  { %4663 = vpow2.f32 %v3712_v26 }
 0xf52   :  { %v4660_v36 = vpop.eup %4659 }
 0xf53   :  { %v2986_v2 = vmul.f32 %v4660_v36, %v4658_v34  ;;  %v4662_v7 = vpop.eup %4661  ;;  %v2985_v41 = vmul.f32 %v4660_v36, %v5813_v29 }
 0xf54   :  { %v2813_v54 = vadd.f32 1.0, %v4662_v7  ;;  %v4664_v0 = vpop.eup %4663 }
 0xf55   :  { %2988 = vrot.lane.b32.xlu1 %v2986_v2, %s4710_s16  ;;  %v2982_v38 = vadd.f32 1.0, %v4664_v0 }
 0xf56   :  { %4665 = vrcp.f32 %v2813_v54 }
 0xf60   :  { %v4666_v35 = vpop.eup %4665 }
 0xfb7   :  { %v2820_v45 = vpop.permute.xlu0 %2819 }
 0xfb8   :  { %v5868_v46 = vadd.f32 %v2820_v45, %v2816_v42 }
 0xfba   :  { %4667 = vtanh.f32 %v5868_v46 }
 0xfbb   :  { %4669 = vrcp.f32 %v2982_v38 }
 0xfc4   :  { %v4668_v22 = vpop.eup %4667 }
 0xfc5   :  { %v2824_v60 = vmul.f32 %v4668_v22, %v4666_v35  ;;  %v4670_v16 = vpop.eup %4669 }
 0xfc7   :  { %v2989_v9 = vpop.permute.xlu1 %2988  ;;  %2995 = vrot.lane.b32.xlu0 %v2824_v60, %s4710_s16 }
 0xfc8   :  { %v5873_v44 = vadd.f32 %v2989_v9, %v2985_v41 }
 0xfca   :  { %4671 = vtanh.f32 %v5873_v44 }
 0xfd4   :  { %v4672_v21 = vpop.eup %4671 }
 0xfd5   :  { %v2993_v47 = vmul.f32 %v4672_v21, %v4670_v16 }
 0xfd7   :  { %3071 = vrot.lane.b32.xlu1 %v2993_v47, %s4710_s16 }
0x1039   :  { %v5877_v50 = vpop.permute.xlu0 %2995 }
0x103a   :  { %3713 = vmatmul.mubr.msk.f32.vlgmr.msra.gmra.mrb[20].mxu1 %vm475_vm0, %v5877_v50 }
0x103b   :  { %4378 = vmatpush1.bf16.msra.mxu1 %v5459_v61  ;;  %3139 = vmatprep.mubr.f32.mxu1 %v4709_v3 }
0x103c   :  { %4380 = vmatprep.subr.bf16.mxu1 %v5462_v63 }
0x103f   :  { %4382 = vmatpush1.bf16.msra.mxu1 %v5478_v13 }
0x1040   :  { %4384 = vmatprep.subr.bf16.mxu1 %v5482_v15 }
0x1043   :  { %4386 = vmatpush1.bf16.msra.mxu1 %v5497_v23 }
0x1044   :  { %4388 = vmatprep.subr.bf16.mxu1 %v5500_v27 }
0x1047   :  { %4390 = vmatpush1.bf16.msra.mxu1 %v5509_v30 }
0x1048   :  { %4424 = vmatprep.subr.bf16.mxu1 %v5376_v19  ;;  %v3525_v19 = vsel %vm3517_vm1, %v5757_v12, %v5877_v50 }
0x1049   :  { %v3072_v29 = vpop.permute.xlu1 %3071 }
0x104a   :  { %3714 = vmatmul.mubr.msk.f32.vlgmr.msra.gmra.mrb[20].mxu1 %vm475_vm0, %v3072_v29  ;;  %3717 = vmatmul.mubr.msk.f32.vlgmr.msra.gmra.mrb[22].mxu0 %vm475_vm0, %v3072_v29 }
0x104b   :  { %4410 = vmatpush1.bf16.msra.mxu0 %v5259_v62  ;;  %3308 = vmatprep.mubr.f32.mxu0 %v4709_v3  ;;  %v3521_v62 = vsel %vm3517_vm1, %v5637_v55, %v5757_v12 }
0x104c   :  { %4412 = vmatprep.subr.bf16.mxu0 %v5271_v1  ;;  %4426 = vmatpush1.bf16.msra.mxu1 %v5387_v24  ;;  %v3523_v1 = vsel %vm3517_vm1, %v5697_v51, %v5817_v43  ;;  %v3540_v24 = vrot.slane %v3525_v19, 2 }
0x104d   :  { %4428 = vmatprep.subr.bf16.mxu1 %v5389_v25  ;;  %3408 = vmatprep.mubr.f32.mxu1 %v4709_v3  ;;  %v3518_v25 = vsel %vm3517_vm1, %v5577_v37, %v5697_v51 }
0x104f   :  { %4414 = vmatpush1.bf16.msra.mxu0 %v5279_v5  ;;  %v3534_v5 = vrot.slane %v3521_v62, 6 }
0x1050   :  { %4416 = vmatprep.subr.bf16.mxu0 %v5289_v8  ;;  %4430 = vmatpush1.bf16.msra.mxu1 %v5405_v31  ;;  %v3537_v8 = vrot.slane %v3523_v1, 4 }
0x1051   :  { %4432 = vmatprep.subr.bf16.mxu1 %v5408_v32  ;;  %v3546_v31 = vsel %vm3545_vm2, %v3518_v25, %v3534_v5  ;;  %v3555_v5 = vld [vmem:[%s6009_s13 + $0x18] sm:$0xff]  ;;  %v3557_v25 = vld [vmem:[%s6009_s13 + $0x28] sm:$0xff] }
0x1053   :  { %4418 = vmatpush1.bf16.msra.mxu0 %v5297_v11  ;;  %v3241_v11 = vrot.slane %v5328_v52, 6 }
0x1054   :  { %4420 = vmatprep.subr.bf16.mxu0 %v5307_v14  ;;  %4434 = vmatpush1.bf16.msra.mxu1 %v5423_v39  ;;  %v3548_v14 = vsel %vm3547_vm3, %v3546_v31, %v3537_v8 }
0x1055   :  { %4436 = vmatprep.subr.bf16.mxu1 %v5426_v40  ;;  %v3550_v32 = vsel %vm3549_vm4, %v3548_v14, %v3540_v24  ;;  %v3556_v24 = vld [vmem:[%s6009_s13 + $0x20] sm:$0xff] }
0x1057   :  { %4422 = vmatpush1.bf16.msra.mxu0 %v5315_v17 }
0x1058   :  { %4438 = vmatpush1.bf16.msra.mxu1 %v5441_v48 }
0x1059   :  { %4440 = vmatprep.subr.bf16.mxu1 %v5444_v49 }
0x105a   :  { %3718 = vmatmul.mubr.msk.f32.vlgmr.msra.gmra.mrb[22].mxu0 %vm475_vm0, %v3241_v11  ;;  %v4463_v11 = vpack.c.bf16 %v3557_v25, %v3556_v24 }
0x105b   :  { %3812 = vmatprep.mubr.msk.f32.mxu0 %vm475_vm0, %v3550_v32 }
0x111d   :  { %v3141_v39 = vpop.f32.mrb[20].mxu1 }
0x111e   :  { %v3146_v40 = vadd.f32 %v3141_v39, %v5556_v57  ;;  %v3143_v37 = vpop.f32.mrb[21].mxu1 }
0x111f   :  { %v3147_v52 = vadd.f32 %v3143_v37, %v5561_v10  ;;  %v3558_v37 = vld [vmem:[%s6009_s13 + $0x30] sm:$0xff] }
0x1120   :  { %v3715_v17 = vmul.f32 -1.442695, %v3146_v40 }
0x1122   :  { %4673 = vpow2.f32 %v3715_v17  ;;  %v3559_v17 = vld [vmem:[%s6009_s13 + $0x38] sm:$0xff] }
0x1123   :  { %4675 = vtanh.f32 %v3147_v52 }
0x112c   :  { %v4674_v55 = vpop.eup %4673 }
0x112d   :  { %v3151_v51 = vadd.f32 1.0, %v4674_v55  ;;  %v3310_v12 = vpop.f32.mrb[22].mxu0  ;;  %v4676_v56 = vpop.eup %4675  ;;  %v4467_v55 = vpack.c.bf16 %v3559_v17, %v3558_v37 }
0x112e   :  { %v3315_v48 = vadd.f32 %v3310_v12, %v5351_v58  ;;  %v3312_v49 = vpop.f32.mrb[23].mxu0  ;;  %v3716_v58 = vmul.f32 -1.442695, %v3147_v52 }
0x112f   :  { %4677 = vrcp.f32 %v3151_v51  ;;  %v3316_v18 = vadd.f32 %v3312_v49, %v5357_v4 }
0x1130   :  { %v3719_v53 = vmul.f32 -1.442695, %v3315_v48 }
0x1131   :  { %v3720_v7 = vmul.f32 -1.442695, %v3316_v18 }
0x1132   :  { %4679 = vpow2.f32 %v3719_v53 }
0x1133   :  { %4681 = vtanh.f32 %v3316_v18 }
0x1139   :  { %v4678_v59 = vpop.eup %4677 }
0x113a   :  { %v3162_v20 = vmul.f32 %v4678_v59, %v4676_v56  ;;  %v3161_v54 = vmul.f32 %v4678_v59, %v5868_v46 }
0x113c   :  { %v4680_v28 = vpop.eup %4679  ;;  %3164 = vrot.lane.b32.xlu0 %v3162_v20, %s4710_s16  ;;  %v3725_v20 = vld [vmem:[%s6010_s14] ss:$0 sm:$0xff] }
0x113d   :  { %v3320_v33 = vadd.f32 1.0, %v4680_v28  ;;  %v4682_v34 = vpop.eup %4681 }
0x113f   :  { %4683 = vrcp.f32 %v3320_v33 }
0x1140   :  { %4685 = vpow2.f32 %v3716_v58 }
0x1141   :  { %4687 = vpow2.f32 %v3720_v7 }
0x1149   :  { %v4684_v36 = vpop.eup %4683 }
0x114a   :  { %v3331_v2 = vmul.f32 %v4684_v36, %v4682_v34  ;;  %v4686_v6 = vpop.eup %4685  ;;  %v3330_v60 = vmul.f32 %v4684_v36, %v5873_v44 }
0x114b   :  { %v3158_v26 = vadd.f32 1.0, %v4686_v6  ;;  %v4688_v45 = vpop.eup %4687 }
0x114c   :  { %3333 = vrot.lane.b32.xlu1 %v3331_v2, %s4710_s16  ;;  %v3327_v22 = vadd.f32 1.0, %v4688_v45 }
0x114d   :  { %4689 = vrcp.f32 %v3158_v26 }
0x1157   :  { %v4690_v0 = vpop.eup %4689 }
0x11ae   :  { %v3165_v4 = vpop.permute.xlu0 %3164 }
0x11af   :  { %v5932_v42 = vadd.f32 %v3165_v4, %v3161_v54 }
0x11b1   :  { %4691 = vtanh.f32 %v5932_v42 }
0x11b2   :  { %4693 = vrcp.f32 %v3327_v22 }
0x11bb   :  { %v4692_v35 = vpop.eup %4691 }
0x11bc   :  { %v3169_v38 = vmul.f32 %v4692_v35, %v4690_v0  ;;  %v4694_v46 = vpop.eup %4693 }
0x11be   :  { %v3334_v41 = vpop.permute.xlu1 %3333  ;;  %3340 = vrot.lane.b32.xlu0 %v3169_v38, %s4710_s16 }
0x11bf   :  { %v3336_v9 = vadd.f32 %v3334_v41, %v3330_v60 }
0x11c1   :  { %4695 = vtanh.f32 %v3336_v9 }
0x11cb   :  { %v4696_v16 = vpop.eup %4695 }
0x11cc   :  { %v3338_v21 = vmul.f32 %v4696_v16, %v4694_v46 }
0x11ce   :  { %3416 = vrot.lane.b32.xlu1 %v3338_v21, %s4710_s16 }
0x1230   :  { %v5938_v47 = vpop.permute.xlu0 %3340 }
0x1231   :  { %3721 = vmatmul.mubr.msk.f32.vlgmr.msra.gmra.mrb[22].mxu1 %vm475_vm0, %v5938_v47  ;;  %v3527_v59 = vsel %vm3517_vm1, %v5817_v43, %v5938_v47 }
0x1232   :  { %4442 = vmatpush1.bf16.msra.mxu1 %v5459_v61  ;;  %3484 = vmatprep.mubr.f32.mxu1 %v4709_v3 }
0x1233   :  { %4444 = vmatprep.subr.bf16.mxu1 %v5462_v63 }
0x1236   :  { %4446 = vmatpush1.bf16.msra.mxu1 %v5478_v13 }
0x1237   :  { %4448 = vmatprep.subr.bf16.mxu1 %v5482_v15 }
0x123a   :  { %4450 = vmatpush1.bf16.msra.mxu1 %v5497_v23 }
0x123b   :  { %4452 = vmatprep.subr.bf16.mxu1 %v5500_v27 }
0x123e   :  { %4454 = vmatpush1.bf16.msra.mxu1 %v5509_v30  ;;  %v3552_v30 = vld [vmem:[%s6009_s13] sm:$0xff] }
0x1240   :  { %v3417_v44 = vpop.permute.xlu1 %3416 }
0x1241   :  { %3722 = vmatmul.mubr.msk.f32.vlgmr.msra.gmra.mrb[22].mxu1 %vm475_vm0, %v3417_v44 }
0x1314   :  { %v3486_v29 = vpop.f32.mrb[22].mxu1 }
0x1315   :  { %v3491_v61 = vadd.f32 %v3486_v29, %v5556_v57  ;;  %v3488_v62 = vpop.f32.mrb[23].mxu1  ;;  %v3553_v57 = vld [vmem:[%s6009_s13 + $0x8] sm:$0xff] }
0x1316   :  { %v3492_v63 = vadd.f32 %v3488_v62, %v5561_v10  ;;  %v3554_v10 = vld [vmem:[%s6009_s13 + $0x10] sm:$0xff]  ;;  %v4455_v19 = vpack.c.bf16 %v3553_v57, %v3552_v30 }
0x1317   :  { %v3723_v3 = vmul.f32 -1.442695, %v3491_v61  ;;  %v4459_v8 = vpack.c.bf16 %v3555_v5, %v3554_v10 }
0x1318   :  { %4456 = vmatprep.subr.bf16.mxu0 %v4455_v19  ;;  %v3724_v31 = vmul.f32 -1.442695, %v3492_v63 }
0x1319   :  { %4697 = vpow2.f32 %v3723_v3  ;;  %4458 = vmatpush3.bf16.msra.mxu0 %v4455_v19 }
0x131a   :  { %4699 = vtanh.f32 %v3492_v63  ;;  %4460 = vmatprep.subr.bf16.mxu0 %v4459_v8 }
0x131d   :  { %4462 = vmatpush3.bf16.msra.mxu0 %v4459_v8 }
0x131e   :  { %4464 = vmatprep.subr.bf16.mxu0 %v4463_v11 }
0x1321   :  { %4466 = vmatpush3.bf16.msra.mxu0 %v4463_v11 }
0x1322   :  { %4468 = vmatprep.subr.bf16.mxu0 %v4467_v55 }
0x1323   :  { %v4698_v13 = vpop.eup %4697 }
0x1324   :  { %v3496_v1 = vadd.f32 1.0, %v4698_v13  ;;  %v4700_v15 = vpop.eup %4699 }
0x1325   :  { %4470 = vmatpush3.bf16.msra.mxu0 %v4467_v55 }
0x1326   :  { %4701 = vrcp.f32 %v3496_v1 }
0x1327   :  { %4703 = vpow2.f32 %v3724_v31 }
0x1330   :  { %v4702_v23 = vpop.eup %4701 }
0x1331   :  { %v3507_v27 = vmul.f32 %v4702_v23, %v4700_v15  ;;  %v4704_v14 = vpop.eup %4703  ;;  %v3506_v39 = vmul.f32 %v4702_v23, %v5932_v42 }
0x1332   :  { %v3503_v32 = vadd.f32 1.0, %v4704_v14 }
0x1333   :  { %3509 = vrot.lane.b32.xlu0 %v3507_v27, %s4710_s16 }
0x1334   :  { %4705 = vrcp.f32 %v3503_v32 }
0x133e   :  { %v4706_v51 = vpop.eup %4705 }
0x13a5   :  { %v3510_v40 = vpop.permute.xlu0 %3509 }
0x13a6   :  { %v3512_v52 = vadd.f32 %v3510_v40, %v3506_v39 }
0x13a8   :  { %4707 = vtanh.f32 %v3512_v52 }
0x13b2   :  { %v4708_v12 = vpop.eup %4707 }
0x13b3   :  { %v3514_v48 = vmul.f32 %v4708_v12, %v4706_v51 }
0x13b5   :  { %3529 = vrot.lane.b32.xlu1 %v3514_v48, %s4710_s16 }
0x1427   :  { %v3530_v49 = vpop.permute.xlu1 %3529 }
0x1428   :  { %v3532_v53 = vsel %vm3517_vm1, %v5877_v50, %v3530_v49 }
0x1429   :  { %v3543_v56 = vrot.slane %v3532_v53, 6 }
0x142b   :  { %v3551_v18 = vsel %vm3545_vm2, %v3527_v59, %v3543_v56 }
0x142c   :  { %3813 = vmatmul.mubr.msk.f32.vlgmr.msra.gmra.mrb[24].mxu0 %vm475_vm0, %v3551_v18 }
0x14ff   :  { %v3814_v28 = vpop.f32.mrb[24].mxu0 }
0x1500   :  { %v3645_v33 = vadd.f32 %v3814_v28, %v3725_v20  ;;  %v3639_v34 = vpop.f32.mrb[25].mxu0 }
0x1501   :  { %v3640_v36 = vadd.f32 %v3725_v20, %v3639_v34 }
0x1502   :  { %3649 = vst [vmem:[%s6011_s15 + $0x8] sm:$0xf] %v3645_v33 }
0x1503   :  { %3648 = vst [vmem:[%s6011_s15] sm:$0xff] %v3640_v36 }

</bundles_post_ra>
